<compile_context>
chip_gen: v7x
topology: tpu7x:2x2x1
jax: 0.10.0
libtpu: 0.0.40
codegen_flags: <defaults>
</compile_context>

<pallas_src>
import math
import numpy as np

import jax
import jax.numpy as jnp
from jax.experimental import pallas as pl
from jax.experimental.pallas import tpu as pltpu


def _round_up(x, m):
    return (x + m - 1) // m * m


def _vmem_capacity_bytes():
    """Physical VMEM per TensorCore; falls back to the smallest known chip (v7x)."""
    try:
        info = pltpu.get_tpu_info()
        for name in ("vmem_capacity_bytes", "vmem_size_bytes", "vmem_bytes"):
            cap = getattr(info, name, None)
            if cap:
                return int(min(int(cap), 128 * 1024 * 1024))
    except Exception:
        pass
    return 64 * 1024 * 1024


def tokenizer_kernel(x_num_ref, idx_ref, num_tab_ref, cat_tab_ref, out_ref):
    """One batch tile -> one lane-dense [b_tile, flat_pad] token slab.

    num_tab is the block-diagonal expansion of `weight` with the (zero-prefixed)
    bias folded into row 0 (the ones column); cat_tab is the block-structured
    expansion of the embedding table hit by a multi-hot matrix.  The whole tile
    is two MXU matmuls and ONE full-width unmasked store.
    """
    x_num = x_num_ref[...]                       # [Bt, n_num_tok_pad] f32 (col 0 = ones)
    idx = idx_ref[...]                           # [Bt, n_cat] int32 (offsets already added)
    n_emb = cat_tab_ref.shape[0]
    bt, n_cat = idx.shape

    # Multi-hot over the global embedding rows.  Per-column index ranges are
    # disjoint (cumulative offsets), so a logical OR is exact.
    # TODO(synk): for n_emb >~ 512 chunk the lane axis inside a fori_loop to bound
    #             vreg pressure instead of materializing full [Bt, n_emb] temporaries.
    lane_iota = jax.lax.broadcasted_iota(jnp.int32, (bt, n_emb), 1)
    mh = idx[:, 0:1] == lane_iota
    for c in range(1, n_cat):                    # static unroll, VPU compares only
        mh = mh | (idx[:, c:c + 1] == lane_iota)

    out = jnp.dot(x_num, num_tab_ref[...],
                  precision=jax.lax.Precision.HIGHEST,
                  preferred_element_type=jnp.float32)
    out = out + jnp.dot(mh.astype(jnp.float32), cat_tab_ref[...],
                        precision=jax.lax.Precision.HIGHEST,
                        preferred_element_type=jnp.float32)
    out_ref[...] = out                           # single lane-dense store


def _pallas_tokenize(x_num_aug, idx, num_tab, cat_tab, *, b_tile, flat_pad,
                     vmem_limit_bytes, single_buffer_tables):
    Bpad, n_num_tok_pad = x_num_aug.shape
    n_cat = idx.shape[1]
    n_emb_pad = cat_tab.shape[0]
    tab_kw = {"pipeline_mode": pl.Buffered(1)} if single_buffer_tables else {}

    return pl.pallas_call(
        tokenizer_kernel,
        out_shape=jax.ShapeDtypeStruct((Bpad, flat_pad), jnp.float32),
        grid_spec=pltpu.PrefetchScalarGridSpec(
            num_scalar_prefetch=0,
            grid=(Bpad // b_tile,),
            in_specs=[
                pl.BlockSpec((b_tile, n_num_tok_pad), lambda i: (i, 0)),
                pl.BlockSpec((b_tile, n_cat), lambda i: (i, 0)),
                pl.BlockSpec((n_num_tok_pad, flat_pad), lambda i: (0, 0), **tab_kw),
                pl.BlockSpec((n_emb_pad, flat_pad), lambda i: (0, 0), **tab_kw),
            ],
            out_specs=pl.BlockSpec((b_tile, flat_pad), lambda i: (i, 0)),
        ),
        compiler_params=pltpu.CompilerParams(
            dimension_semantics=("parallel",),
            vmem_limit_bytes=int(vmem_limit_bytes),
        ),
    )(x_num_aug, idx, num_tab, cat_tab)


def tokenizer_forward(x_num, x_cat, weight, emb, bias, categories, *, b_tile=1024):
    B, d_num = x_num.shape
    categories = list(categories)
    n_cat = len(categories)
    assert n_cat >= 1, "numeric-only (categories=None) path not implemented"
    d_token = weight.shape[1]
    n_num_tok = d_num + 1
    n_tokens = n_num_tok + n_cat
    n_emb = emb.shape[0]

    flat = n_tokens * d_token
    flat_pad = _round_up(flat, 128)              # lane-dense output slab
    n_num_tok_pad = _round_up(n_num_tok, 8)      # sublane-aligned LHS / table rows
    n_emb_pad = _round_up(n_emb, 8)

    # --- chip-aware batch-tile sizing (v5e/v6e: 128 MiB VMEM, v7x: 64 MiB per TC).
    vmem_cap = _vmem_capacity_bytes()
    budget = (vmem_cap * 3) // 4                 # ~96 MiB on v5e/v6e, ~48 MiB on v7x

    def _vmem_bytes(bt):
        io = bt * (flat_pad + 128 + 128) * 4                 # out + x_num + idx blocks
        tabs = (n_num_tok_pad + n_emb_pad) * flat_pad * 4    # num_tab + cat_tab
        scratch = bt * (flat_pad + 2 * _round_up(n_emb_pad, 128)) * 4  # out acc + mh temps
        return 2 * io + 2 * tabs + scratch       # conservatively double-buffer everything

    b_tile = _round_up(max(8, min(b_tile, _round_up(B, 8))), 8)
    if B >= 16:
        # keep the grid >= 2 so both v7x TensorCores (and the pipeline) stay busy;
        # the extra ~0.35us grid-step overhead is negligible elsewhere.
        b_tile = min(b_tile, max(8, _round_up((B + 1) // 2, 8)))
    while b_tile > 8 and _vmem_bytes(b_tile) > budget:
        b_tile = max(8, _round_up(b_tile // 2, 8))
    Bpad = _round_up(B, b_tile)
    vmem_limit = min(vmem_cap, budget + (8 << 20))

    # --- glue (plain JAX): ones column, adjusted categorical indices, tables.
    offsets = jnp.asarray(
        np.concatenate([[0], np.cumsum(categories[:-1])]).astype(np.int32))
    cats = jnp.asarray(categories, jnp.int32)

    x_num_aug = jnp.concatenate(
        [jnp.ones((B, 1), jnp.float32), x_num.astype(jnp.float32)], axis=1)
    x_num_aug = jnp.pad(x_num_aug, ((0, Bpad - B), (0, n_num_tok_pad - n_num_tok)))

    idx = jnp.where(x_cat == -1, cats[None] - 1, x_cat).astype(jnp.int32) + offsets[None]
    idx = jnp.pad(idx, ((0, Bpad - B), (0, 0)))  # padded rows -> row 0 (valid), sliced off

    # num_tab[j, k*D:(k+1)*D] = weight[j] if k == j else 0; bias folded into row 0
    # (the ones column broadcasts it to every batch row through the matmul).
    eye = jnp.eye(n_num_tok, dtype=jnp.float32)
    num_tab = (eye[:, :, None] * weight.astype(jnp.float32)[:, None, :]
               ).reshape(n_num_tok, n_num_tok * d_token)
    num_tab = jnp.pad(num_tab, ((0, n_num_tok_pad - n_num_tok),
                                (0, flat_pad - n_num_tok * d_token)))
    bias_flat = jnp.concatenate([jnp.zeros((d_token,), jnp.float32),
                                 bias.astype(jnp.float32).reshape(-1)])
    num_tab = num_tab.at[0].add(jnp.pad(bias_flat, (0, flat_pad - flat)))

    # cat_tab[e, (n_num_tok+c)*D : +D] = emb[e] iff global row e belongs to category c.
    cat_of_row = np.repeat(np.arange(n_cat), categories)                 # static
    row_onehot = jnp.asarray(np.eye(n_cat, dtype=np.float32)[cat_of_row])
    cat_tab = (row_onehot[:, :, None] * emb.astype(jnp.float32)[:, None, :]
               ).reshape(n_emb, n_cat * d_token)
    cat_tab = jnp.pad(cat_tab, ((0, n_emb_pad - n_emb),
                                (n_num_tok * d_token, flat_pad - flat)))

    # --- pallas call; grid-invariant tables single-buffered where supported.
    out_flat, last_err = None, None
    for single_buffer in (True, False):
        try:
            out_flat = _pallas_tokenize(
                x_num_aug, idx, num_tab, cat_tab,
                b_tile=b_tile, flat_pad=flat_pad, vmem_limit_bytes=vmem_limit,
                single_buffer_tables=single_buffer)
            out_flat = jax.block_until_ready(out_flat)
            break
        except Exception as err:   # pipeline_mode unsupported -> retry double-buffered
            last_err = err
            out_flat = None
    if out_flat is None:
        raise last_err

    return out_flat[:B, :flat].reshape(B, n_tokens, d_token)


def tokenizer_ref(x_num, x_cat, weight, emb, bias, categories):
    # Pure-JAX reference mirroring the PyTorch forward (functional w.r.t. x_cat).
    B = x_num.shape[0]
    cats = jnp.asarray(categories, jnp.int32)
    offsets = jnp.concatenate(
        [jnp.zeros((1,), jnp.int32), jnp.cumsum(cats[:-1])])
    x_num_aug = jnp.concatenate([jnp.ones((B, 1), x_num.dtype), x_num], axis=1)
    x = weight[None] * x_num_aug[:, :, None]
    idx = jnp.where(x_cat == -1, cats[None] - 1, x_cat) + offsets[None]
    x = jnp.concatenate([x, emb[idx]], axis=1)
    bias_full = jnp.concatenate([jnp.zeros((1, bias.shape[1]), bias.dtype), bias], axis=0)
    return x + bias_full[None]


if __name__ == "__main__":
    # Small deterministic config: d_numerical=6, categories=[3,5,4], d_token=32, bias=True.
    # B=48 gives b_tile=24 (grid >= 2) and exercises the padding paths.
    B = 48
    d_num = 6
    categories = [3, 5, 4]
    d_token = 32
    n_cat = len(categories)
    n_emb = sum(categories)
    d_bias = d_num + n_cat

    key = jax.random.PRNGKey(0)
    k_w, k_b, k_e, k_x, *k_cat = jax.random.split(key, 4 + n_cat)

    # kaiming_uniform_(a=sqrt(5)) on [rows, d_token] => U(-1/sqrt(d_token), 1/sqrt(d_token))
    bound = 1.0 / math.sqrt(d_token)
    weight = jax.random.uniform(k_w, (d_num + 1, d_token), jnp.float32, -bound, bound)
    bias = jax.random.uniform(k_b, (d_bias, d_token), jnp.float32, -bound, bound)
    emb = jax.random.uniform(k_e, (n_emb, d_token), jnp.float32, -bound, bound)
    # zero the "last" embedding row of each category (as in the module __init__)
    offs_np = [0]
    for c in categories[:-1]:
        offs_np.append(offs_np[-1] + c)
    zero_rows = jnp.asarray([o + c - 1 for o, c in zip(offs_np, categories)], jnp.int32)
    emb = emb.at[zero_rows].set(0.0)

    # Inputs: x_num dense floats, x_cat ints in [-1, categories[c]-1] (includes the -1 path).
    x_num = jax.random.normal(k_x, (B, d_num), jnp.float32)
    x_cat = jnp.stack(
        [jax.random.randint(k_cat[c], (B,), -1, categories[c], jnp.int32)
         for c in range(n_cat)], axis=1)

    out = tokenizer_forward(x_num, x_cat, weight, emb, bias, categories)
    out = jax.block_until_ready(out)

    ref = tokenizer_ref(x_num, x_cat, weight, emb, bias, categories)
    assert out.shape == (B, 1 + d_num + n_cat, d_token)
    max_err = float(jnp.max(jnp.abs(out - ref)))
    assert jnp.allclose(out, ref, atol=1e-4, rtol=1e-4), f"mismatch vs reference (max abs err={max_err})"

    print("KERNEL_OK")
</pallas_src>

<mosaic_0001>
module attributes {stable_mosaic.version = 11 : i64} {
  func.func @tokenizer_kernel(%arg0: i32, %arg1: memref<24x8xf32, #tpu.memory_space<vmem>>, %arg2: memref<24x3xi32, #tpu.memory_space<vmem>>, %arg3: memref<8x384xf32, #tpu.memory_space<vmem>>, %arg4: memref<16x384xf32, #tpu.memory_space<vmem>>, %arg5: memref<24x384xf32, #tpu.memory_space<vmem>>) attributes {dimension_semantics = [#tpu.dimension_semantics<parallel>], iteration_bounds = array<i64: 2>, scalar_prefetch = 0 : i64, scratch_operands = 0 : i64, tpu.core_type = #tpu.core_type<tc>, window_params = [{transform_indices = @transform_0, window_bounds = array<i64: 24, 8>}, {transform_indices = @transform_1, window_bounds = array<i64: 24, 3>}, {pipeline_mode = #tpu.pipeline_mode<synchronous>, transform_indices = @transform_2, window_bounds = array<i64: 8, 384>}, {pipeline_mode = #tpu.pipeline_mode<synchronous>, transform_indices = @transform_3, window_bounds = array<i64: 16, 384>}, {transform_indices = @transform_4, window_bounds = array<i64: 24, 384>}]} {
    %c0 = arith.constant 0 : index
    %c0_0 = arith.constant 0 : index
    %0 = vector.load %arg1[%c0, %c0_0] : memref<24x8xf32, #tpu.memory_space<vmem>>, vector<24x8xf32>
    %c0_1 = arith.constant 0 : index
    %c0_2 = arith.constant 0 : index
    %1 = vector.load %arg2[%c0_1, %c0_2] : memref<24x3xi32, #tpu.memory_space<vmem>>, vector<24x3xi32>
    %2 = tpu.iota {dimensions = array<i32: 1>} : vector<24x16xi32>
    %3 = vector.extract_strided_slice %1 {offsets = [0, 0], sizes = [24, 1], strides = [1, 1]} : vector<24x3xi32> to vector<24x1xi32>
    %4 = vector.broadcast %3 : vector<24x1xi32> to vector<24x16xi32>
    %5 = arith.cmpi eq, %4, %2 : vector<24x16xi32>
    %6 = vector.extract_strided_slice %1 {offsets = [0, 1], sizes = [24, 1], strides = [1, 1]} : vector<24x3xi32> to vector<24x1xi32>
    %7 = vector.broadcast %6 : vector<24x1xi32> to vector<24x16xi32>
    %8 = arith.cmpi eq, %7, %2 : vector<24x16xi32>
    %9 = arith.ori %5, %8 : vector<24x16xi1>
    %10 = vector.extract_strided_slice %1 {offsets = [0, 2], sizes = [24, 1], strides = [1, 1]} : vector<24x3xi32> to vector<24x1xi32>
    %11 = vector.broadcast %10 : vector<24x1xi32> to vector<24x16xi32>
    %12 = arith.cmpi eq, %11, %2 : vector<24x16xi32>
    %13 = arith.ori %9, %12 : vector<24x16xi1>
    %c0_3 = arith.constant 0 : index
    %c0_4 = arith.constant 0 : index
    %14 = vector.load %arg3[%c0_3, %c0_4] : memref<8x384xf32, #tpu.memory_space<vmem>>, vector<8x384xf32>
    %cst = arith.constant dense<0.000000e+00> : vector<24x384xf32>
    %15 = tpu.matmul %0, %14, %cst {dimension_numbers = #tpu.dot_dimension_numbers<[1], [0], [0], [1], [0, 0, 1, 1], [], []>, precision = #tpu.contract_precision<fp32>} : vector<24x8xf32>, vector<8x384xf32>, vector<24x384xf32> -> vector<24x384xf32>
    %16 = arith.extui %13 : vector<24x16xi1> to vector<24x16xi32>
    %17 = arith.sitofp %16 : vector<24x16xi32> to vector<24x16xf32>
    %c0_5 = arith.constant 0 : index
    %c0_6 = arith.constant 0 : index
    %18 = vector.load %arg4[%c0_5, %c0_6] : memref<16x384xf32, #tpu.memory_space<vmem>>, vector<16x384xf32>
    %cst_7 = arith.constant dense<0.000000e+00> : vector<24x384xf32>
    %19 = tpu.matmul %17, %18, %cst_7 {dimension_numbers = #tpu.dot_dimension_numbers<[1], [0], [0], [1], [0, 0, 1, 1], [], []>, precision = #tpu.contract_precision<fp32>} : vector<24x16xf32>, vector<16x384xf32>, vector<24x384xf32> -> vector<24x384xf32>
    %20 = arith.addf %15, %19 : vector<24x384xf32>
    %c0_8 = arith.constant 0 : index
    %c0_9 = arith.constant 0 : index
    %21 = vector.load %arg5[%c0_8, %c0_9] : memref<24x384xf32, #tpu.memory_space<vmem>>, vector<24x384xf32>
    tpu.vector_store %arg5[%c0_8, %c0_9], %20 {strides = array<i32>} : memref<24x384xf32, #tpu.memory_space<vmem>>, vector<24x384xf32>,
    return
  }
  func.func @transform_0(%arg0: i32) -> (i32, i32) {
    %c0_i32 = arith.constant 0 : i32
    %c0_i32_0 = arith.constant 0 : i32
    return %arg0, %c0_i32 : i32, i32
  }
  func.func @transform_1(%arg0: i32) -> (i32, i32) {
    %c0_i32 = arith.constant 0 : i32
    %c0_i32_0 = arith.constant 0 : i32
    return %arg0, %c0_i32 : i32, i32
  }
  func.func @transform_2(%arg0: i32) -> (i32, i32) {
    %c0_i32 = arith.constant 0 : i32
    %c0_i32_0 = arith.constant 0 : i32
    %c0_i32_1 = arith.constant 0 : i32
    return %c0_i32, %c0_i32_0 : i32, i32
  }
  func.func @transform_3(%arg0: i32) -> (i32, i32) {
    %c0_i32 = arith.constant 0 : i32
    %c0_i32_0 = arith.constant 0 : i32
    %c0_i32_1 = arith.constant 0 : i32
    return %c0_i32, %c0_i32_0 : i32, i32
  }
  func.func @transform_4(%arg0: i32) -> (i32, i32) {
    %c0_i32 = arith.constant 0 : i32
    %c0_i32_0 = arith.constant 0 : i32
    return %arg0, %c0_i32 : i32, i32
  }
}

module attributes {stable_mosaic.version = 11 : i64} {
  func.func @tokenizer_kernel(%arg0: i32, %arg1: memref<24x8xf32, #tpu.memory_space<vmem>>, %arg2: memref<24x3xi32, #tpu.memory_space<vmem>>, %arg3: memref<8x384xf32, #tpu.memory_space<vmem>>, %arg4: memref<16x384xf32, #tpu.memory_space<vmem>>, %arg5: memref<24x384xf32, #tpu.memory_space<vmem>>) attributes {dimension_semantics = [#tpu.dimension_semantics<parallel>], iteration_bounds = array<i64: 2>, scalar_prefetch = 0 : i64, scratch_operands = 0 : i64, tpu.core_type = #tpu.core_type<tc>, window_params = [{transform_indices = @transform_0, window_bounds = array<i64: 24, 8>}, {transform_indices = @transform_1, window_bounds = array<i64: 24, 3>}, {pipeline_mode = #tpu.pipeline_mode<synchronous>, transform_indices = @transform_2, window_bounds = array<i64: 8, 384>}, {pipeline_mode = #tpu.pipeline_mode<synchronous>, transform_indices = @transform_3, window_bounds = array<i64: 16, 384>}, {transform_indices = @transform_4, window_bounds = array<i64: 24, 384>}]} {
    %c0 = arith.constant 0 : index
    %c0_0 = arith.constant 0 : index
    %0 = vector.load %arg1[%c0, %c0_0] : memref<24x8xf32, #tpu.memory_space<vmem>>, vector<24x8xf32>
    %c0_1 = arith.constant 0 : index
    %c0_2 = arith.constant 0 : index
    %1 = vector.load %arg2[%c0_1, %c0_2] : memref<24x3xi32, #tpu.memory_space<vmem>>, vector<24x3xi32>
    %2 = tpu.iota {dimensions = array<i32: 1>} : vector<24x16xi32>
    %3 = vector.extract_strided_slice %1 {offsets = [0, 0], sizes = [24, 1], strides = [1, 1]} : vector<24x3xi32> to vector<24x1xi32>
    %4 = vector.broadcast %3 : vector<24x1xi32> to vector<24x16xi32>
    %5 = arith.cmpi eq, %4, %2 : vector<24x16xi32>
    %6 = vector.extract_strided_slice %1 {offsets = [0, 1], sizes = [24, 1], strides = [1, 1]} : vector<24x3xi32> to vector<24x1xi32>
    %7 = vector.broadcast %6 : vector<24x1xi32> to vector<24x16xi32>
    %8 = arith.cmpi eq, %7, %2 : vector<24x16xi32>
    %9 = arith.ori %5, %8 : vector<24x16xi1>
    %10 = vector.extract_strided_slice %1 {offsets = [0, 2], sizes = [24, 1], strides = [1, 1]} : vector<24x3xi32> to vector<24x1xi32>
    %11 = vector.broadcast %10 : vector<24x1xi32> to vector<24x16xi32>
    %12 = arith.cmpi eq, %11, %2 : vector<24x16xi32>
    %13 = arith.ori %9, %12 : vector<24x16xi1>
    %c0_3 = arith.constant 0 : index
    %c0_4 = arith.constant 0 : index
    %14 = vector.load %arg3[%c0_3, %c0_4] : memref<8x384xf32, #tpu.memory_space<vmem>>, vector<8x384xf32>
    %cst = arith.constant dense<0.000000e+00> : vector<24x384xf32>
    %15 = tpu.matmul %0, %14, %cst {dimension_numbers = #tpu.dot_dimension_numbers<[1], [0], [0], [1], [0, 0, 1, 1], [], []>, precision = #tpu.contract_precision<fp32>} : vector<24x8xf32>, vector<8x384xf32>, vector<24x384xf32> -> vector<24x384xf32>
    %16 = arith.extui %13 : vector<24x16xi1> to vector<24x16xi32>
    %17 = arith.sitofp %16 : vector<24x16xi32> to vector<24x16xf32>
    %c0_5 = arith.constant 0 : index
    %c0_6 = arith.constant 0 : index
    %18 = vector.load %arg4[%c0_5, %c0_6] : memref<16x384xf32, #tpu.memory_space<vmem>>, vector<16x384xf32>
    %cst_7 = arith.constant dense<0.000000e+00> : vector<24x384xf32>
    %19 = tpu.matmul %17, %18, %cst_7 {dimension_numbers = #tpu.dot_dimension_numbers<[1], [0], [0], [1], [0, 0, 1, 1], [], []>, precision = #tpu.contract_precision<fp32>} : vector<24x16xf32>, vector<16x384xf32>, vector<24x384xf32> -> vector<24x384xf32>
    %20 = arith.addf %15, %19 : vector<24x384xf32>
    %c0_8 = arith.constant 0 : index
    %c0_9 = arith.constant 0 : index
    %21 = vector.load %arg5[%c0_8, %c0_9] : memref<24x384xf32, #tpu.memory_space<vmem>>, vector<24x384xf32>
    tpu.vector_store %arg5[%c0_8, %c0_9], %20 {strides = array<i32>} : memref<24x384xf32, #tpu.memory_space<vmem>>, vector<24x384xf32>,
    return
  }
  func.func @transform_0(%arg0: i32) -> (i32, i32) {
    %c0_i32 = arith.constant 0 : i32
    %c0_i32_0 = arith.constant 0 : i32
    return %arg0, %c0_i32 : i32, i32
  }
  func.func @transform_1(%arg0: i32) -> (i32, i32) {
    %c0_i32 = arith.constant 0 : i32
    %c0_i32_0 = arith.constant 0 : i32
    return %arg0, %c0_i32 : i32, i32
  }
  func.func @transform_2(%arg0: i32) -> (i32, i32) {
    %c0_i32 = arith.constant 0 : i32
    %c0_i32_0 = arith.constant 0 : i32
    %c0_i32_1 = arith.constant 0 : i32
    return %c0_i32, %c0_i32_0 : i32, i32
  }
  func.func @transform_3(%arg0: i32) -> (i32, i32) {
    %c0_i32 = arith.constant 0 : i32
    %c0_i32_0 = arith.constant 0 : i32
    %c0_i32_1 = arith.constant 0 : i32
    return %c0_i32, %c0_i32_0 : i32, i32
  }
  func.func @transform_4(%arg0: i32) -> (i32, i32) {
    %c0_i32 = arith.constant 0 : i32
    %c0_i32_0 = arith.constant 0 : i32
    return %arg0, %c0_i32 : i32, i32
  }
}

</mosaic_0001>

<bundles_post_ra>
// kernel: tpu_custom_call.1
= control target key start
LH: loop header
LB: loop body
LE: loop exit
PB: predicated region body
PF: predicated region fallthrough
CT: control target
= control target key end

     0   :  { %9 = vsyncpa [#allocation3], 0  ;;  %s3679_s0 = inlined_call_operand.vmem [shape: f32[48,8], index: 0, kind: input, shape index: {}]   ;;  %s3680_s1 = inlined_call_operand.vmem [shape: s32[48,3], index: 1, kind: input, shape index: {}]   ;;  %s3681_s2 = inlined_call_operand.vmem [shape: f32[8,384], index: 2, kind: input, shape index: {}]   ;;  %s3682_s3 = inlined_call_operand.vmem [shape: f32[16,384], index: 3, kind: input, shape index: {}]   ;;  %s3683_s4 = inlined_call_operand.hbm [shape: f32[48,384], index: 4, kind: output, shape index: {}]  }
   0x1   :  { %11 = vsyncpa [#allocation3 + $0x1], 0  ;;  %s3191_s15 = smov 0   ;;  %s3193_s16 = smov 0  }
   0x2   :  { %s3195_s17 = smov 0   ;;  %s3197_s18 = smov 0  }
   0x3 LB: > { %s3212_s19 = sadd.s32 4294967295, %s3155_s18   ;;  %s2633_s20 = sadd.s32 4294967294, %s3155_s18   ;;  %s3155_s18 = sphi %s3197_s18, %s3689_s18   ;;  %s3151_s17 = sphi %s3195_s17, %s3688_s17   ;;  %s3147_s16 = sphi %s3193_s16, %s3687_s16   ;;  %s3143_s15 = sphi %s3191_s15, %s3686_s15  }
   0x4   : > { %s3216_s21 = sadd.s32 1, %s3155_s18   ;;  %s118_s22 = sadd.s32 1, %s3151_s17 }
   0x5   : > { %s115_s23 = ssub.s32 %s3155_s18, %s3216_s21  ;;  %p128_p0 = scmp.ne.s32.totalorder %s3151_s17, %s3147_s16 }
   0x6   : > { %p116_p1 = scmp.eq.s32.totalorder %s115_s23, 0  ;;  %p129_p2 = scmp.eq.s32.totalorder %s3212_s19, 1 }
   0x7   : > { %p134_p3 = scmp.ne.s32.totalorder %s3147_s16, %s3143_s15  ;;  %p135_p4 = scmp.eq.s32.totalorder %s2633_s20, 1 }
   0x8   : > { %s3227_s24 = scalar_select %p116_p1, %s3151_s17, %s118_s22  }
   0x9   : > { %p3229_p5 = por %p129_p2, %p128_p0  ;;  %p3233_p6 = por %p135_p4, %p134_p3 }
   0xa   : > { %p2636_p7 = scmp.ge.s32.totalorder %s3155_s18, 1  ;;  %p177_p8 = scmp.lt.s32.totalorder %s3155_s18, 3 }
   0xc   : > { %p178_p9 = pnand %p2636_p7, %p177_p8 }
   0xd   : > { %s208_s27 = smul.u32 (!%p178_p9), 3, %s3212_s19  ;;  %v3157_v0 = vmov (!%p178_p9), 2   ;;  %v3158_v1 = vmov (!%p178_p9), 0   ;;  %v3159_v4 = vmov (!%p178_p9), 1   ;;  %v3160_v5 = vmov (!%p178_p9), 0.0   ;;  %v281_v6 = vld [vmem:[%s3682_s3 + $0x8] sm:$0xff] (!%p178_p9) }
   0xe   : > { %181 = sbr.rel (%p178_p9) target bundleno = 546 (0x222), region = 36  ;;  %3087 = vset.pattern.permute.xlu1 (!%p178_p9), %v3157_v0  ;;  %3085 = vset.pattern.permute.xlu0 (!%p178_p9), %v3158_v1  ;;  %v284_v7 = vld [vmem:[%s3682_s3 + $0x20] sm:$0xff] (!%p178_p9)  ;;  %v296_v8 = vand.u32 (!%p178_p9), 4294901760, %v281_v6  ;;  %v283_v11 = vld [vmem:[%s3682_s3 + $0x18] sm:$0xff] (!%p178_p9)  ;;  %v282_v12 = vld [vmem:[%s3682_s3 + $0x10] sm:$0xff] (!%p178_p9)  ;;  %v3161_v25 = vmov (!%p178_p9), 0.0|0.0   ;;  %v227_v56 = vlaneseq (!%p178_p9) }
   0xf   : > { %p209_p10 = scmp.lt.s32.totalorder (!%p178_p9), %s208_s27, 5  ;;  %364 = vmatprep.mubr.f32.mxu0 (!%p178_p9), %v3160_v5  ;;  %v300_v9 = vand.u32 (!%p178_p9), 4294901760, %v284_v7  ;;  %v280_v10 = vld [vmem:[%s3682_s3] sm:$0xff] (!%p178_p9)  ;;  %v302_v14 = vand.u32 (!%p178_p9), 4294901760, %v283_v11  ;;  %v285_v15 = vld [vmem:[%s3682_s3 + $0x28] sm:$0xff] (!%p178_p9)  ;;  %v886_v16 = vand.u32 (!%p178_p9), 4294901760, %v282_v12  ;;  %2885 = vmatprep.subr.bf16.mxu1 (!%p178_p9), %v3161_v25 }
  0x10   : > { %v298_v13 = vand.u32 (!%p178_p9), 4294901760, %v280_v10  ;;  %v889_v19 = vand.u32 (!%p178_p9), 4294901760, %v285_v15  ;;  %vm3162_vm0 = vmmov (!%p178_p9), 0   ;;  %v3288_v27 = vsub.f32 (!%p178_p9), %v281_v6, %v296_v8  ;;  %s205_s10 = sand.u32 (!%p178_p9), 1, %s3147_s16   ;;  %s3043_s13 = smul.u32 (!%p178_p9), 1152, %s3212_s19 }
  0x11   : > { %v3267_v18 = vpack.c.bf16 (!%p178_p9), %v300_v9, %v296_v8  ;;  %v3276_v23 = vsub.f32 (!%p178_p9), %v283_v11, %v302_v14  ;;  %v3278_v24 = vsub.f32 (!%p178_p9), %v282_v12, %v886_v16  ;;  %2721 = vmatprep.mubr.msk.f32.mxu1 (!%p178_p9), %vm3162_vm0, %v3160_v5  ;;  %v3290_v28 = vsub.f32 (!%p178_p9), %v284_v7, %v300_v9  ;;  %s3035_s11 = smul.u32 (!%p178_p9), 72, %s205_s10  ;;  %s3638_s19 = scalar_lea.sflag (!%p178_p9), [#allocation3], %s205_s10 }
  0x12   : > { %v3269_v20 = vpack.c.bf16 (!%p178_p9), %v302_v14, %v298_v13  ;;  %v3271_v21 = vpack.c.bf16 (!%p178_p9), %v889_v19, %v886_v16  ;;  %v3274_v22 = vsub.f32 (!%p178_p9), %v280_v10, %v298_v13  ;;  %v3282_v26 = vsub.f32 (!%p178_p9), %v285_v15, %v889_v19  ;;  %s3634_s23 = scalar_lea.hbm (!%p178_p9), %s3683_s4, %s3043_s13  ;;  %s3163_s30 = smov (!%p178_p9), [#allocation2]  }
  0x13   : > { %2862 = vmatprep.subr.bf16.mxu0 (!%p178_p9), %v3267_v18  ;;  %v400_v29 = vand.u32 (!%p178_p9), 4294901760, %v3288_v27  ;;  %v412_v30 = vand.u32 (!%p178_p9), 4294901760, %v3290_v28  ;;  %v418_v32 = vand.u32 (!%p178_p9), 4294901760, %v3276_v23  ;;  %v985_v33 = vand.u32 (!%p178_p9), 4294901760, %v3278_v24  ;;  %s207_s12 = scalar_lea.vmem (!%p178_p9), [#allocation2], %s3035_s11 }
  0x14   : > { %2864 = vmatpush1.bf16.msra.mxu0 (!%p178_p9), %v3269_v20  ;;  %2887 = vmatpush3.bf16.msra.mxu1 (!%p178_p9), %v3271_v21  ;;  %v406_v31 = vand.u32 (!%p178_p9), 4294901760, %v3274_v22  ;;  %v992_v34 = vand.u32 (!%p178_p9), 4294901760, %v3282_v26  ;;  %v2869_v50 = vpack.c.bf16 (!%p178_p9), %v3290_v28, %v3288_v27  ;;  %v2871_v51 = vpack.c.bf16 (!%p178_p9), %v3276_v23, %v3274_v22  ;;  %s2559_s14 = sshll.u32 (!%p178_p9), %s207_s12, 4  ;;  %s3636_s14 = int_to_ptr.vmem [resolvable:$true] %s2559_s14 }
  0x15   : > { %s3691_s27 = smov (!%p209_p10, %s208_s27), 5  ;;  %2888 = vmatprep.subr.bf16.mxu1 %v3161_v25  ;;  %v401_v35 = vsub.f32 %v3288_v27, %v400_v29  ;;  %v413_v36 = vsub.f32 %v3290_v28, %v412_v30  ;;  %v419_v38 = vsub.f32 %v3276_v23, %v418_v32  ;;  %v986_v39 = vsub.f32 %v3278_v24, %v985_v33  ;;  %s3093_s29 = scalar_lea.vmem %s3636_s14, 1152 }
  0x16   : > { %s2637_s28 = sshll.u32 %s3691_s27, 3  ;;  %v407_v37 = vsub.f32 %v3274_v22, %v406_v31  ;;  %v993_v40 = vsub.f32 %v3282_v26, %v992_v34  ;;  %v2892_v52 = vpack.c.bf16 %v3282_v26, %v3278_v24  ;;  %v3310_v53 = vpack.c.bf16 %v412_v30, %v400_v29  ;;  %v272_v22 = vld [vmem:[%s3681_s2 + $0x8] sm:$0xff]  ;;  %p3094_p11 = scmp.ne.s32.totalorder %s3636_s14, %s3093_s29 }
  0x17   : > { %s218_s5 = scalar_lea.vmem %s3680_s1, %s2637_s28  ;;  %v402_v41 = vand.u32 4294901760, %v401_v35  ;;  %v414_v42 = vand.u32 4294901760, %v413_v36  ;;  %v420_v44 = vand.u32 4294901760, %v419_v38  ;;  %v987_v45 = vand.u32 4294901760, %v986_v39  ;;  %s212_s7 = scalar_lea.vmem %s3679_s0, %s2637_s28 }
  0x18   : > { %v224_v2 = vld [vmem:[%s218_s5] sm:$0xff]  ;;  %v225_v3 = vld [vmem:[%s218_s5 + $0x8] sm:$0xff]  ;;  %v226_v17 = vld [vmem:[%s218_s5 + $0x10] sm:$0xff]  ;;  %v408_v43 = vand.u32 4294901760, %v407_v37  ;;  %v994_v46 = vand.u32 4294901760, %v993_v40  ;;  %v3312_v54 = vpack.c.bf16 %v418_v32, %v406_v31  ;;  %v3314_v55 = vpack.c.bf16 %v992_v34, %v985_v33  ;;  %p3095_p12 = pnand %p3094_p11, %p3229_p5  ;;  %s3097_s5 = sshll.u32 %s3163_s30, 4  ;;  %s3098_s5 = int_to_ptr.vmem [resolvable:$false] %s3097_s5 }
  0x19   : > { %257 = vperm.xlu1 %3087, %v224_v2   ;;  %230 = vperm.xlu0 %3085, %v224_v2   ;;  %v2865_v47 = vpack.c.bf16 %v414_v42, %v402_v41  ;;  %v228_v59 = vand.u32 127, %v227_v56  ;;  %vm286_vm5 = vcmask 130048   ;;  %v221_v23 = vld [vmem:[%s212_s7] sm:$0xff]  ;;  %v222_v26 = vld [vmem:[%s212_s7 + $0x8] sm:$0xff]  ;;  %v223_v33 = vld [vmem:[%s212_s7 + $0x10] sm:$0xff]  ;;  %s3099_s6 = scalar_lea.vmem %s3098_s5, 2304  ;;  %p3100_p0 = scmp.lt.s32.totalorder %s3636_s14, %s3098_s5 }
  0x1a   : > { %v2867_v48 = vpack.c.bf16 %v420_v44, %v408_v43  ;;  %v2889_v49 = vpack.c.bf16 %v994_v46, %v987_v45  ;;  %p3096_p13 = pneg %p3095_p12  ;;  %p3101_p1 = scmp.lt.s32.totalorder %s3099_s6, %s3093_s29 }
  0x1b   : > { %2866 = vmatprep.subr.bf16.mxu0 %v2865_v47 }
  0x1c   : > { %p3102_p2 = por %p3101_p1, %p3100_p0 }
  0x1d   : > { %3088 = vset.pattern.permute.xlu1 %v3158_v1  ;;  %3086 = vset.pattern.permute.xlu0 %v3159_v4 }
  0x1e   : > { %233 = vperm.xlu1 %3088, %v225_v3   ;;  %242 = vperm.xlu0 %3086, %v224_v2   ;;  %p3103_p3 = pnand %p3102_p2, %p3096_p13 }
  0x22   : > { %3089 = vset.pattern.permute.xlu1 %v3159_v4  ;;  %3090 = vset.pattern.permute.xlu0 %v3157_v0 }
  0x23   : > { %245 = vperm.xlu1 %3089, %v225_v3   ;;  %260 = vperm.xlu0 %3090, %v225_v3  }
  0x27   : > { %3091 = vset.pattern.permute.xlu1 %v3158_v1  ;;  %263 = vperm.xlu0 %3090, %v226_v17  }
  0x28   : > { %236 = vperm.xlu1 %3091, %v226_v17  }
  0x2c   : > { %3092 = vset.pattern.permute.xlu1 %v3159_v4 }
  0x2d   : > { %248 = vperm.xlu1 %3092, %v226_v17  }
  0x98   : > { %v258_v57 = vpop.permute.xlu1 %257  ;;  %v231_v58 = vpop.permute.xlu0 %230 }
  0x99   : > { %vm238_vm1 = vcmp.eq.s32.totalorder %v231_v58, %v228_v59  ;;  %vm265_vm3 = vcmp.eq.s32.totalorder %v258_v57, %v228_v59 }
  0x9d   : > { %v234_v60 = vpop.permute.xlu1 %233  ;;  %v243_v61 = vpop.permute.xlu0 %242 }
  0x9e   : > { %vm250_vm2 = vcmp.eq.s32.totalorder %v243_v61, %v228_v59  ;;  %vm239_vm7 = vcmp.eq.s32.totalorder %v234_v60, %v228_v59 }
  0x9f   : > { %vm253_vm4 = vmor %vm238_vm1, %vm250_vm2  ;;  %vm1430_vm2 = vcmask 64512  }
  0xa0   : > { %vm268_vm6 = vmor %vm253_vm4, %vm265_vm3  ;;  %v1435_v32 = vsel %vm1430_vm2, %v222_v26, 0  ;;  %v1438_v39 = vsel %vm1430_vm2, %v223_v33, 0 }
  0xa1   : > { %v3317_v62 = vsel %vm268_vm6, 1.0, %v3160_v5  ;;  %v3458_v38 = vand.u32 4294901760, %v1435_v32  ;;  %v3477_v44 = vand.u32 4294901760, %v1438_v39 }
  0xa2   : > { %v246_v63 = vpop.permute.xlu1 %245  ;;  %v261_v0 = vpop.permute.xlu0 %260  ;;  %v288_v1 = vsel %vm286_vm5, %v3317_v62, 0 }
  0xa3   : > { %vm251_vm8 = vcmp.eq.s32.totalorder %v246_v63, %v228_v59  ;;  %vm266_vm9 = vcmp.eq.s32.totalorder %v261_v0, %v228_v59  ;;  %v366_v2 = vsub.f32 %v288_v1, %v288_v1  ;;  %v3475_v43 = vsub.f32 %v1435_v32, %v3458_v38 }
  0xa4   : > { %vm254_vm10 = vmor %vm239_vm7, %vm251_vm8 }
  0xa5   : > { %vm269_vm11 = vmor %vm254_vm10, %vm266_vm9  ;;  %v3321_v3 = vand.u32 4294901760, %v366_v2 }
  0xa6   : > { %v3324_v4 = vsel %vm269_vm11, 1.0, %v3160_v5  ;;  %v264_v12 = vpop.permute.xlu0 %263 }
  0xa7   : > { %v237_v6 = vpop.permute.xlu1 %236  ;;  %v368_v7 = vsub.f32 %v366_v2, %v3321_v3  ;;  %v291_v8 = vsel %vm286_vm5, %v3324_v4, 0  ;;  %vm267_vm14 = vcmp.eq.s32.totalorder %v264_v12, %v228_v59 }
  0xa8   : > { %v377_v9 = vsub.f32 %v291_v8, %v291_v8  ;;  %vm240_vm12 = vcmp.eq.s32.totalorder %v237_v6, %v228_v59 }
  0xa9   : > { %v369_v10 = vand.u32 4294901760, %v368_v7 }
  0xaa   : > { %v3329_v11 = vand.u32 4294901760, %v377_v9 }
  0xab   : > { %370 = vmatmul.mubr.f32.vlgmr.msra.gmra.mrb[0].mxu0 %v369_v10  ;;  %2722 = vmatmul.mubr.f32.vlgmr.msra.gmra.mrb[0].mxu1 %v369_v10 }
  0xac   : > { %v249_v13 = vpop.permute.xlu1 %248  ;;  %375 = vmatprep.mubr.f32.mxu0 %v3160_v5  ;;  %2724 = vmatprep.mubr.msk.f32.mxu1 %vm3162_vm0, %v3160_v5  ;;  %v379_v14 = vsub.f32 %v377_v9, %v3329_v11 }
  0xad   : > { %vm252_vm13 = vcmp.eq.s32.totalorder %v249_v13, %v228_v59  ;;  %2868 = vmatpush1.bf16.msra.mxu0 %v2867_v48  ;;  %2890 = vmatpush3.bf16.msra.mxu1 %v2889_v49  ;;  %v3495_v48 = vsub.f32 %v1438_v39, %v3477_v44 }
  0xae   : > { %vm255_vm15 = vmor %vm240_vm12, %vm252_vm13  ;;  %v380_v15 = vand.u32 4294901760, %v379_v14  ;;  %2870 = vmatprep.subr.bf16.mxu0 %v2869_v50  ;;  %2891 = vmatprep.subr.bf16.mxu1 %v3161_v25  ;;  %v3504_v50 = vand.u32 4294901760, %v3475_v43 }
  0xaf   : > { %vm270_vm1 = vmor %vm255_vm15, %vm267_vm14 }
  0xb0   : > { %v3337_v16 = vsel %vm270_vm1, 1.0, %v3160_v5  ;;  %381 = vmatmul.mubr.f32.gmra.mrb[2].mxu0 %v380_v15  ;;  %2725 = vmatmul.mubr.f32.gmra.mrb[2].mxu1 %v380_v15 }
  0xb1   : > { %386 = vmatprep.mubr.f32.mxu0 %v3160_v5  ;;  %2727 = vmatprep.mubr.msk.f32.mxu1 %vm3162_vm0, %v3160_v5  ;;  %v294_v17 = vsel %vm286_vm5, %v3337_v16, 0 }
  0xb2   : > { %v388_v19 = vsub.f32 %v294_v17, %v294_v17 }
  0xb4   : > { %v389_v27 = vand.u32 4294901760, %v388_v19 }
  0xb6   : > { %v390_v28 = vsub.f32 %v388_v19, %v389_v27 }
  0xb8   : > { %v391_v29 = vand.u32 4294901760, %v390_v28 }
  0xba   : > { %392 = vmatmul.mubr.f32.gmra.mrb[4].mxu0 %v391_v29  ;;  %2728 = vmatmul.mubr.f32.gmra.mrb[4].mxu1 %v391_v29 }
  0xbb   : > { %482 = vmatprep.mubr.f32.mxu0 %v3160_v5  ;;  %2734 = vmatprep.mubr.msk.f32.mxu1 %vm3162_vm0, %v3160_v5 }
  0xbe   : > { %2642 = vmatmul.mubr.msk.f32.vlgmr.msra.gmra.mrb[0].mxu0 %vm286_vm5, %v3317_v62  ;;  %2735 = vmatmul.mubr.msk.f32.vlgmr.msra.gmra.mrb[0].mxu1 %vm286_vm5, %v3317_v62 }
  0xbf   : > { %2872 = vmatpush1.bf16.msra.mxu0 %v2871_v51  ;;  %2893 = vmatpush3.bf16.msra.mxu1 %v2892_v52 }
  0xc0   : > { %489 = vmatprep.mubr.f32.mxu0 %v3160_v5  ;;  %2737 = vmatprep.mubr.msk.f32.mxu1 %vm3162_vm0, %v3160_v5 }
  0xc1   : > { %2874 = vmatprep.subr.bf16.mxu0 %v3267_v18  ;;  %2894 = vmatprep.subr.bf16.mxu1 %v3161_v25 }
  0xc2   : > { %2643 = vmatmul.mubr.msk.f32.gmra.mrb[2].mxu0 %vm286_vm5, %v3324_v4  ;;  %2738 = vmatmul.mubr.msk.f32.gmra.mrb[2].mxu1 %vm286_vm5, %v3324_v4 }
  0xc3   : > { %496 = vmatprep.mubr.f32.mxu0 %v3160_v5  ;;  %2740 = vmatprep.mubr.msk.f32.mxu1 %vm3162_vm0, %v3160_v5 }
  0xc6   : > { %2644 = vmatmul.mubr.msk.f32.gmra.mrb[4].mxu0 %vm286_vm5, %v3337_v16  ;;  %2741 = vmatmul.mubr.msk.f32.gmra.mrb[4].mxu1 %vm286_vm5, %v3337_v16 }
  0xc7   : > { %576 = vmatprep.mubr.f32.mxu0 %v3160_v5  ;;  %2747 = vmatprep.mubr.msk.f32.mxu1 %vm3162_vm0, %v3160_v5 }
  0xca   : > { %579 = vmatmul.mubr.f32.vlgmr.msra.gmra.mrb[0].mxu0 %v366_v2  ;;  %2748 = vmatmul.mubr.f32.vlgmr.msra.gmra.mrb[0].mxu1 %v366_v2 }
  0xcb   : > { %2876 = vmatpush1.bf16.msra.mxu0 %v3269_v20  ;;  %2896 = vmatpush3.bf16.msra.mxu1 %v3271_v21 }
  0xcc   : > { %584 = vmatprep.mubr.f32.mxu0 %v3160_v5  ;;  %2750 = vmatprep.mubr.msk.f32.mxu1 %vm3162_vm0, %v3160_v5 }
  0xcd   : > { %2878 = vmatprep.subr.bf16.mxu0 %v3310_v53  ;;  %2897 = vmatprep.subr.bf16.mxu1 %v3161_v25 }
  0xce   : > { %587 = vmatmul.mubr.f32.gmra.mrb[2].mxu0 %v377_v9  ;;  %2751 = vmatmul.mubr.f32.gmra.mrb[2].mxu1 %v377_v9 }
  0xcf   : > { %592 = vmatprep.mubr.f32.mxu0 %v3160_v5  ;;  %2753 = vmatprep.mubr.msk.f32.mxu1 %vm3162_vm0, %v3160_v5 }
  0xd2   : > { %595 = vmatmul.mubr.f32.gmra.mrb[4].mxu0 %v388_v19  ;;  %2754 = vmatmul.mubr.f32.gmra.mrb[4].mxu1 %v388_v19 }
  0xd3   : > { %669 = vmatprep.mubr.f32.mxu0 %v3160_v5  ;;  %2760 = vmatprep.mubr.msk.f32.mxu1 %vm3162_vm0, %v3160_v5 }
  0xd6   : > { %673 = vmatmul.mubr.f32.vlgmr.msra.gmra.mrb[0].mxu0 %v3321_v3  ;;  %2761 = vmatmul.mubr.f32.vlgmr.msra.gmra.mrb[0].mxu1 %v3321_v3 }
  0xd7   : > { %2880 = vmatpush1.bf16.msra.mxu0 %v3312_v54  ;;  %2899 = vmatpush3.bf16.msra.mxu1 %v3314_v55  ;;  %v1521_v54 = vsub.f32 %v3475_v43, %v3504_v50  ;;  %v3522_v55 = vand.u32 4294901760, %v3495_v48 }
  0xd8   : > { %678 = vmatprep.mubr.f32.mxu0 %v3160_v5  ;;  %2763 = vmatprep.mubr.msk.f32.mxu1 %vm3162_vm0, %v3160_v5 }
  0xd9   : > { %2882 = vmatprep.subr.bf16.mxu0 %v3267_v18  ;;  %2900 = vmatprep.subr.bf16.mxu1 %v3161_v25  ;;  %v3414_v18 = vand.u32 4294901760, %v272_v22  ;;  %v1432_v25 = vsel %vm1430_vm2, %v221_v23, 0  ;;  %v1522_v58 = vand.u32 4294901760, %v1521_v54  ;;  %v1532_v59 = vsub.f32 %v3495_v48, %v3522_v55 }
  0xda   : > { %682 = vmatmul.mubr.f32.gmra.mrb[2].mxu0 %v3329_v11  ;;  %2764 = vmatmul.mubr.f32.gmra.mrb[2].mxu1 %v3329_v11  ;;  %v3432_v31 = vand.u32 4294901760, %v1432_v25 }
  0xdb   : > { %687 = vmatprep.mubr.f32.mxu0 %v3160_v5  ;;  %2766 = vmatprep.mubr.msk.f32.mxu1 %vm3162_vm0, %v3160_v5  ;;  %v3417_v24 = vsub.f32 %v272_v22, %v3414_v18  ;;  %v1533_v60 = vand.u32 4294901760, %v1532_v59 }
  0xdc   : > { %v3456_v37 = vsub.f32 %v1432_v25, %v3432_v31 }
  0xdd   : > { %v1542_v30 = vand.u32 4294901760, %v3417_v24 }
  0xde   : > { %691 = vmatmul.mubr.f32.gmra.mrb[4].mxu0 %v389_v27  ;;  %2767 = vmatmul.mubr.f32.gmra.mrb[4].mxu1 %v389_v27  ;;  %v3484_v45 = vand.u32 4294901760, %v3456_v37 }
  0xdf   : > { %773 = vmatprep.mubr.f32.mxu0 %v3160_v5  ;;  %2773 = vmatprep.mubr.msk.f32.mxu1 %vm3162_vm0, %v3160_v5  ;;  %v1543_v36 = vsub.f32 %v3417_v24, %v1542_v30 }
  0xe0   : > { %v1510_v49 = vsub.f32 %v3456_v37, %v3484_v45 }
  0xe1   : > { %v1544_v42 = vand.u32 4294901760, %v1543_v36 }
  0xe2   : > { %2645 = vmatmul.mubr.msk.f32.vlgmr.msra.gmra.mrb[0].mxu0 %vm286_vm5, %v3317_v62  ;;  %2774 = vmatmul.mubr.msk.f32.vlgmr.msra.gmra.mrb[0].mxu1 %vm286_vm5, %v3317_v62  ;;  %v1511_v53 = vand.u32 4294901760, %v1510_v49 }
  0xe3   : > { %2884 = vmatpush1.bf16.msra.mxu0 %v3269_v20  ;;  %2902 = vmatpush3.bf16.msra.mxu1 %v3271_v21  ;;  %v271_v20 = vld [vmem:[%s3681_s2] sm:$0xff]  ;;  %v273_v21 = vld [vmem:[%s3681_s2 + $0x10] sm:$0xff] }
  0xe4   : > { %780 = vmatprep.mubr.f32.mxu0 %v3160_v5  ;;  %2776 = vmatprep.mubr.msk.f32.mxu1 %vm3162_vm0, %v3160_v5  ;;  %v3448_v34 = vand.u32 4294901760, %v271_v20  ;;  %v3450_v35 = vand.u32 4294901760, %v273_v21 }
  0xe5   : > { %1441 = vmatprep.subr.mxu0 %v3414_v18  ;;  %2795 = vmatprep.subr.mxu1 %v3160_v5 }
  0xe6   : > { %2646 = vmatmul.mubr.msk.f32.gmra.mrb[2].mxu0 %vm286_vm5, %v3324_v4  ;;  %2777 = vmatmul.mubr.msk.f32.gmra.mrb[2].mxu1 %vm286_vm5, %v3324_v4  ;;  %v3469_v40 = vsub.f32 %v271_v20, %v3448_v34  ;;  %v3472_v41 = vsub.f32 %v273_v21, %v3450_v35 }
  0xe7   : > { %787 = vmatprep.mubr.f32.mxu0 %v3160_v5  ;;  %2779 = vmatprep.mubr.msk.f32.mxu1 %vm3162_vm0, %v3160_v5 }
  0xe8   : > { %v1548_v46 = vand.u32 4294901760, %v3469_v40  ;;  %v2102_v47 = vand.u32 4294901760, %v3472_v41 }
  0xea   : > { %2647 = vmatmul.mubr.msk.f32.gmra.mrb[4].mxu0 %vm286_vm5, %v3337_v16  ;;  %2780 = vmatmul.mubr.msk.f32.gmra.mrb[4].mxu1 %vm286_vm5, %v3337_v16  ;;  %v1549_v51 = vsub.f32 %v3469_v40, %v1548_v46  ;;  %v2103_v52 = vsub.f32 %v3472_v41, %v2102_v47 }
  0xeb   : > { %863 = vmatprep.mubr.f32.mxu0 %v3160_v5  ;;  %2786 = vmatprep.mubr.msk.f32.mxu1 %vm3162_vm0, %v3160_v5 }
  0xec   : > { %v1550_v56 = vand.u32 4294901760, %v1549_v51  ;;  %v2104_v57 = vand.u32 4294901760, %v2103_v52 }
  0xee   : > { %2648 = vmatmul.mubr.msk.f32.vlgmr.msra.gmra.mrb[0].mxu0 %vm286_vm5, %v3317_v62  ;;  %2787 = vmatmul.mubr.msk.f32.vlgmr.msra.gmra.mrb[0].mxu1 %vm286_vm5, %v3317_v62 }
  0xef   : > { %1443 = vmatpush1.msra.mxu0 %v3448_v34  ;;  %2796 = vmatpush3.msra.mxu1 %v3450_v35 }
  0xf0   : > { %870 = vmatprep.mubr.f32.mxu0 %v3160_v5  ;;  %2789 = vmatprep.mubr.msk.f32.mxu1 %vm3162_vm0, %v3160_v5 }
  0xf1   : > { %1545 = vmatprep.subr.mxu0 %v1544_v42  ;;  %2806 = vmatprep.subr.mxu1 %v3160_v5 }
  0xf2   : > { %2649 = vmatmul.mubr.msk.f32.gmra.mrb[2].mxu0 %vm286_vm5, %v3324_v4  ;;  %2790 = vmatmul.mubr.msk.f32.gmra.mrb[2].mxu1 %vm286_vm5, %v3324_v4 }
  0xf3   : > { %877 = vmatprep.mubr.f32.mxu0 %v3160_v5  ;;  %2792 = vmatprep.mubr.msk.f32.mxu1 %vm3162_vm0, %v3160_v5 }
  0xf6   : > { %2650 = vmatmul.mubr.msk.f32.gmra.mrb[4].mxu0 %vm286_vm5, %v3337_v16  ;;  %2793 = vmatmul.mubr.msk.f32.gmra.mrb[4].mxu1 %vm286_vm5, %v3337_v16 }
  0xf7   : > { %1506 = vmatprep.mubr.f32.mxu0 %v3160_v5  ;;  %2797 = vmatprep.mubr.msk.f32.mxu1 %vm3162_vm0, %v3160_v5 }
  0xfa   : > { %1512 = vmatmul.mubr.f32.vlgmr.msra.gmra.mrb[0].mxu0 %v1511_v53  ;;  %2798 = vmatmul.mubr.f32.vlgmr.msra.gmra.mrb[0].mxu1 %v1511_v53 }
  0xfb   : > { %1551 = vmatpush1.msra.mxu0 %v1550_v56  ;;  %2807 = vmatpush3.msra.mxu1 %v2104_v57 }
  0xfc   : > { %1517 = vmatprep.mubr.f32.mxu0 %v3160_v5  ;;  %2800 = vmatprep.mubr.msk.f32.mxu1 %vm3162_vm0, %v3160_v5 }
  0xfd   : > { %1638 = vmatprep.subr.mxu0 %v3417_v24  ;;  %2817 = vmatprep.subr.mxu1 %v3160_v5 }
  0xfe   : > { %1523 = vmatmul.mubr.f32.gmra.mrb[2].mxu0 %v1522_v58  ;;  %2801 = vmatmul.mubr.f32.gmra.mrb[2].mxu1 %v1522_v58 }
  0xff   : > { %1528 = vmatprep.mubr.f32.mxu0 %v3160_v5  ;;  %2803 = vmatprep.mubr.msk.f32.mxu1 %vm3162_vm0, %v3160_v5 }
 0x102   : > { %1534 = vmatmul.mubr.f32.gmra.mrb[4].mxu0 %v1533_v60  ;;  %2804 = vmatmul.mubr.f32.gmra.mrb[4].mxu1 %v1533_v60 }
 0x103   : > { %1614 = vmatprep.mubr.f32.mxu0 %v3160_v5  ;;  %2808 = vmatprep.mubr.msk.f32.mxu1 %vm3162_vm0, %v3160_v5 }
 0x106   : > { %1616 = vmatmul.mubr.f32.vlgmr.msra.gmra.mrb[0].mxu0 %v3432_v31  ;;  %2809 = vmatmul.mubr.f32.vlgmr.msra.gmra.mrb[0].mxu1 %v3432_v31 }
 0x107   : > { %1641 = vmatpush1.msra.mxu0 %v3469_v40  ;;  %2818 = vmatpush3.msra.mxu1 %v3472_v41 }
 0x108   : > { %1621 = vmatprep.mubr.f32.mxu0 %v3160_v5  ;;  %2811 = vmatprep.mubr.msk.f32.mxu1 %vm3162_vm0, %v3160_v5 }
 0x109   : > { %1730 = vmatprep.subr.mxu0 %v3414_v18  ;;  %2828 = vmatprep.subr.mxu1 %v3160_v5 }
 0x10a   : > { %1623 = vmatmul.mubr.f32.gmra.mrb[2].mxu0 %v3458_v38  ;;  %2812 = vmatmul.mubr.f32.gmra.mrb[2].mxu1 %v3458_v38 }
 0x10b   : > { %1628 = vmatprep.mubr.f32.mxu0 %v3160_v5  ;;  %2814 = vmatprep.mubr.msk.f32.mxu1 %vm3162_vm0, %v3160_v5 }
 0x10e   : > { %1630 = vmatmul.mubr.f32.gmra.mrb[4].mxu0 %v3477_v44  ;;  %2815 = vmatmul.mubr.f32.gmra.mrb[4].mxu1 %v3477_v44 }
 0x10f   : > { %1704 = vmatprep.mubr.f32.mxu0 %v3160_v5  ;;  %2819 = vmatprep.mubr.msk.f32.mxu1 %vm3162_vm0, %v3160_v5 }
 0x112   : > { %1707 = vmatmul.mubr.f32.vlgmr.msra.gmra.mrb[0].mxu0 %v3456_v37  ;;  %2820 = vmatmul.mubr.f32.vlgmr.msra.gmra.mrb[0].mxu1 %v3456_v37 }
 0x113   : > { %1732 = vmatpush1.msra.mxu0 %v3448_v34  ;;  %2829 = vmatpush3.msra.mxu1 %v3450_v35 }
 0x114   : > { %1712 = vmatprep.mubr.f32.mxu0 %v3160_v5  ;;  %2822 = vmatprep.mubr.msk.f32.mxu1 %vm3162_vm0, %v3160_v5 }
 0x115   : > { %1826 = vmatprep.subr.mxu0 %v1542_v30  ;;  %2839 = vmatprep.subr.mxu1 %v3160_v5 }
 0x116   : > { %1715 = vmatmul.mubr.f32.gmra.mrb[2].mxu0 %v3475_v43  ;;  %2823 = vmatmul.mubr.f32.gmra.mrb[2].mxu1 %v3475_v43 }
 0x117   : > { %1720 = vmatprep.mubr.f32.mxu0 %v3160_v5  ;;  %2825 = vmatprep.mubr.msk.f32.mxu1 %vm3162_vm0, %v3160_v5 }
 0x11a   : > { %1723 = vmatmul.mubr.f32.gmra.mrb[4].mxu0 %v3495_v48  ;;  %2826 = vmatmul.mubr.f32.gmra.mrb[4].mxu1 %v3495_v48 }
 0x11b   : > { %1795 = vmatprep.mubr.f32.mxu0 %v3160_v5  ;;  %2830 = vmatprep.mubr.msk.f32.mxu1 %vm3162_vm0, %v3160_v5 }
 0x11e   : > { %1799 = vmatmul.mubr.f32.vlgmr.msra.gmra.mrb[0].mxu0 %v3484_v45  ;;  %2831 = vmatmul.mubr.f32.vlgmr.msra.gmra.mrb[0].mxu1 %v3484_v45 }
 0x11f   : > { %1830 = vmatpush1.msra.mxu0 %v1548_v46  ;;  %2840 = vmatpush3.msra.mxu1 %v2102_v47 }
 0x120   : > { %1804 = vmatprep.mubr.f32.mxu0 %v3160_v5  ;;  %2833 = vmatprep.mubr.msk.f32.mxu1 %vm3162_vm0, %v3160_v5 }
 0x121   : > { %1916 = vmatprep.subr.mxu0 %v3414_v18  ;;  %2850 = vmatprep.subr.mxu1 %v3160_v5 }
 0x122   : > { %1808 = vmatmul.mubr.f32.gmra.mrb[2].mxu0 %v3504_v50  ;;  %2834 = vmatmul.mubr.f32.gmra.mrb[2].mxu1 %v3504_v50 }
 0x123   : > { %1813 = vmatprep.mubr.f32.mxu0 %v3160_v5  ;;  %2836 = vmatprep.mubr.msk.f32.mxu1 %vm3162_vm0, %v3160_v5 }
 0x126   : > { %1817 = vmatmul.mubr.f32.gmra.mrb[4].mxu0 %v3522_v55  ;;  %2837 = vmatmul.mubr.f32.gmra.mrb[4].mxu1 %v3522_v55 }
 0x127   : > { %1893 = vmatprep.mubr.f32.mxu0 %v3160_v5  ;;  %2841 = vmatprep.mubr.msk.f32.mxu1 %vm3162_vm0, %v3160_v5 }
 0x12a   : > { %1895 = vmatmul.mubr.f32.vlgmr.msra.gmra.mrb[0].mxu0 %v3432_v31  ;;  %2842 = vmatmul.mubr.f32.vlgmr.msra.gmra.mrb[0].mxu1 %v3432_v31 }
 0x12b   : > { %1918 = vmatpush1.msra.mxu0 %v3448_v34  ;;  %2851 = vmatpush3.msra.mxu1 %v3450_v35 }
 0x12c   : > { %1900 = vmatprep.mubr.f32.mxu0 %v3160_v5  ;;  %2844 = vmatprep.mubr.msk.f32.mxu1 %vm3162_vm0, %v3160_v5 }
 0x12e   : > { %1902 = vmatmul.mubr.f32.gmra.mrb[2].mxu0 %v3458_v38  ;;  %2845 = vmatmul.mubr.f32.gmra.mrb[2].mxu1 %v3458_v38 }
 0x12f   : > { %1907 = vmatprep.mubr.f32.mxu0 %v3160_v5  ;;  %2847 = vmatprep.mubr.msk.f32.mxu1 %vm3162_vm0, %v3160_v5 }
 0x132   : > { %1909 = vmatmul.mubr.f32.gmra.mrb[4].mxu0 %v3477_v44  ;;  %2848 = vmatmul.mubr.f32.gmra.mrb[4].mxu1 %v3477_v44 }
 0x133   : > { %1981 = vmatprep.mubr.f32.mxu0 %v3160_v5  ;;  %2852 = vmatprep.mubr.msk.f32.mxu1 %vm3162_vm0, %v3160_v5 }
 0x136   : > { %1983 = vmatmul.mubr.f32.vlgmr.msra.gmra.mrb[0].mxu0 %v3432_v31  ;;  %2853 = vmatmul.mubr.f32.vlgmr.msra.gmra.mrb[0].mxu1 %v3432_v31 }
 0x137   : > { %1988 = vmatprep.mubr.f32.mxu0 %v3160_v5  ;;  %2855 = vmatprep.mubr.msk.f32.mxu1 %vm3162_vm0, %v3160_v5 }
 0x13a   : > { %1990 = vmatmul.mubr.f32.gmra.mrb[2].mxu0 %v3458_v38  ;;  %2856 = vmatmul.mubr.f32.gmra.mrb[2].mxu1 %v3458_v38 }
 0x13b   : > { %1995 = vmatprep.mubr.f32.mxu0 %v3160_v5  ;;  %2858 = vmatprep.mubr.msk.f32.mxu1 %vm3162_vm0, %v3160_v5 }
 0x13e   : > { %1997 = vmatmul.mubr.f32.gmra.mrb[4].mxu0 %v3477_v44  ;;  %2859 = vmatmul.mubr.f32.gmra.mrb[4].mxu1 %v3477_v44 }
 0x209   : > { %v1984_v61 = vpop.f32.mrb[0].mxu0  ;;  %v2519_v62 = vpop.f32.mrb[0].mxu1 }
 0x20a   : > { %2535 = vst [vmem:[%s207_s12] sm:$0xff] %v1984_v61  ;;  %2537 = vst [vmem:[%s207_s12 + $0x10] sm:$0xff] %v2519_v62  ;;  %v1986_v63 = vpop.f32.mrb[1].mxu0  ;;  %v2854_v0 = vpop.f32.mrb[1].mxu1 }
 0x20b   : > { %2536 = vst [vmem:[%s207_s12 + $0x8] sm:$0xff] %v1986_v63 }
 0x20d   : > { %v1991_v1 = vpop.f32.mrb[2].mxu0  ;;  %v2525_v2 = vpop.f32.mrb[2].mxu1 }
 0x20e   : > { %2538 = vst [vmem:[%s207_s12 + $0x18] sm:$0xff] %v1991_v1  ;;  %2540 = vst [vmem:[%s207_s12 + $0x28] sm:$0xff] %v2525_v2  ;;  %v1993_v5 = vpop.f32.mrb[3].mxu0  ;;  %v2857_v3 = vpop.f32.mrb[3].mxu1 }
 0x20f   : > { %2539 = vst [vmem:[%s207_s12 + $0x20] sm:$0xff] %v1993_v5 }
 0x211   : > { %v1998_v4 = vpop.f32.mrb[4].mxu0  ;;  %v2531_v6 = vpop.f32.mrb[4].mxu1 }
 0x212   : > { %2541 = vst [vmem:[%s207_s12 + $0x30] sm:$0xff] %v1998_v4  ;;  %2543 = vst [vmem:[%s207_s12 + $0x40] sm:$0xff] %v2531_v6  ;;  %v2000_v7 = vpop.f32.mrb[5].mxu0  ;;  %v2860_v8 = vpop.f32.mrb[5].mxu1 }
 0x213   : > { %2542 = vst [vmem:[%s207_s12 + $0x38] sm:$0xff] %v2000_v7 }
 0x214   : > { %3106 = shalt.err (!%p3103_p3)
}
 0x215   : > { %s3107_s7 = scalar_lea.hbm %s3634_s23, 1152  ;;  %s3111_s8 = scalar_lea.hbm %s3683_s4, 2304 }
 0x216   : > { %p3108_p4 = scmp.ne.s32.totalorder %s3634_s23, %s3107_s7  ;;  %p3112_p9 = scmp.lt.u32.totalorder %s3634_s23, %s3683_s4 }
 0x217   : > { %p3113_p10 = scmp.lt.u32.totalorder %s3111_s8, %s3107_s7  ;;  %p3115_p12 = scmp.lt.u32.totalorder %s3107_s7, %s3634_s23 }
 0x218   : > { %p3109_p7 = pnand %p3108_p4, %p3229_p5 }
 0x219   : > { %p3114_p11 = por %p3113_p10, %p3112_p9 }
 0x21a   : > { %p3110_p8 = pneg %p3109_p7 }
 0x21b   : > { %p3116_p13 = por %p3115_p12, %p3114_p11 }
 0x21d   : > { %p3117_p0 = pnand %p3116_p13, %p3110_p8 }
 0x21f   : > { %3120 = shalt.err (!%p3117_p0)
}
 0x220   : > { %s3164_s11 = smov 384   ;;  %s3165_s12 = smov 24  }
 0x221   : > { %3037 = dma.vmem_to_hbm [thread:$0]  (%p3229_p5), %s3636_s14, 1152, %s3634_s23, %s3638_s19, %s3164_s11, %s3164_s11, %s3165_s12  }
 0x222 PF: > { %p3044_p1 = scmp.ge.s32.totalorder %s3155_s18, 2  ;;  %s2574_s13 = sand.u32 1, %s3143_s15  }
 0x223   : > { %s2575_s20 = scalar_lea.sflag [#allocation3], %s2574_s13 }
 0x224   : > { %p3040_p2 = pnand %p3044_p1, %p3233_p6 }
 0x226   : > { %3138 = dma.done.wait (!%p3040_p2), %s2575_s20, 1152  }
 0x227   : > { %3140 = vsyncadd (!%p3040_p2), %s2575_s20, 4294966144  ;;  %p14_p3 = scmp.ge.s32.totalorder %s3216_s21, 4   ;;  %s3686_s15 = smov %s3147_s16 }
 0x228   : > { %s3687_s16 = smov %s3151_s17  ;;  %s3688_s17 = smov %s3227_s24 }
 0x229   : > { %s3689_s18 = smov %s3216_s21  ;;  %16 = sbr.rel (!%p14_p3) target bundleno = 3 (0x3), region = 74 }
 0x230   :  { %2580 = vsyncpa [#allocation3], 1 }
 0x231   :  { %2582 = vsyncpa [#allocation3 + $0x1], 1 }

// kernel: tpu_custom_call.1
= control target key start
LH: loop header
LB: loop body
LE: loop exit
PB: predicated region body
PF: predicated region fallthrough
CT: control target
= control target key end

     0   :  { %9 = vsyncpa [#allocation3], 0  ;;  %s3679_s0 = inlined_call_operand.vmem [shape: f32[48,8], index: 0, kind: input, shape index: {}]   ;;  %s3680_s1 = inlined_call_operand.vmem [shape: s32[48,3], index: 1, kind: input, shape index: {}]   ;;  %s3681_s2 = inlined_call_operand.vmem [shape: f32[8,384], index: 2, kind: input, shape index: {}]   ;;  %s3682_s3 = inlined_call_operand.vmem [shape: f32[16,384], index: 3, kind: input, shape index: {}]   ;;  %s3683_s4 = inlined_call_operand.hbm [shape: f32[48,384], index: 4, kind: output, shape index: {}]  }
   0x1   :  { %11 = vsyncpa [#allocation3 + $0x1], 0  ;;  %s3191_s15 = smov 0   ;;  %s3193_s16 = smov 0  }
   0x2   :  { %s3195_s17 = smov 0   ;;  %s3197_s18 = smov 0  }
   0x3 LB: > { %s3212_s19 = sadd.s32 4294967295, %s3155_s18   ;;  %s2633_s20 = sadd.s32 4294967294, %s3155_s18   ;;  %s3155_s18 = sphi %s3197_s18, %s3689_s18   ;;  %s3151_s17 = sphi %s3195_s17, %s3688_s17   ;;  %s3147_s16 = sphi %s3193_s16, %s3687_s16   ;;  %s3143_s15 = sphi %s3191_s15, %s3686_s15  }
   0x4   : > { %s3216_s21 = sadd.s32 1, %s3155_s18   ;;  %s118_s22 = sadd.s32 1, %s3151_s17 }
   0x5   : > { %s115_s23 = ssub.s32 %s3155_s18, %s3216_s21  ;;  %p128_p0 = scmp.ne.s32.totalorder %s3151_s17, %s3147_s16 }
   0x6   : > { %p116_p1 = scmp.eq.s32.totalorder %s115_s23, 0  ;;  %p129_p2 = scmp.eq.s32.totalorder %s3212_s19, 1 }
   0x7   : > { %p134_p3 = scmp.ne.s32.totalorder %s3147_s16, %s3143_s15  ;;  %p135_p4 = scmp.eq.s32.totalorder %s2633_s20, 1 }
   0x8   : > { %s3227_s24 = scalar_select %p116_p1, %s3151_s17, %s118_s22  }
   0x9   : > { %p3229_p5 = por %p129_p2, %p128_p0  ;;  %p3233_p6 = por %p135_p4, %p134_p3 }
   0xa   : > { %p2636_p7 = scmp.ge.s32.totalorder %s3155_s18, 1  ;;  %p177_p8 = scmp.lt.s32.totalorder %s3155_s18, 3 }
   0xc   : > { %p178_p9 = pnand %p2636_p7, %p177_p8 }
   0xd   : > { %s208_s27 = smul.u32 (!%p178_p9), 3, %s3212_s19  ;;  %v3157_v0 = vmov (!%p178_p9), 2   ;;  %v3158_v1 = vmov (!%p178_p9), 0   ;;  %v3159_v4 = vmov (!%p178_p9), 1   ;;  %v3160_v5 = vmov (!%p178_p9), 0.0   ;;  %v281_v6 = vld [vmem:[%s3682_s3 + $0x8] sm:$0xff] (!%p178_p9) }
   0xe   : > { %181 = sbr.rel (%p178_p9) target bundleno = 546 (0x222), region = 36  ;;  %3087 = vset.pattern.permute.xlu1 (!%p178_p9), %v3157_v0  ;;  %3085 = vset.pattern.permute.xlu0 (!%p178_p9), %v3158_v1  ;;  %v284_v7 = vld [vmem:[%s3682_s3 + $0x20] sm:$0xff] (!%p178_p9)  ;;  %v296_v8 = vand.u32 (!%p178_p9), 4294901760, %v281_v6  ;;  %v283_v11 = vld [vmem:[%s3682_s3 + $0x18] sm:$0xff] (!%p178_p9)  ;;  %v282_v12 = vld [vmem:[%s3682_s3 + $0x10] sm:$0xff] (!%p178_p9)  ;;  %v3161_v25 = vmov (!%p178_p9), 0.0|0.0   ;;  %v227_v56 = vlaneseq (!%p178_p9) }
   0xf   : > { %p209_p10 = scmp.lt.s32.totalorder (!%p178_p9), %s208_s27, 5  ;;  %364 = vmatprep.mubr.f32.mxu0 (!%p178_p9), %v3160_v5  ;;  %v300_v9 = vand.u32 (!%p178_p9), 4294901760, %v284_v7  ;;  %v280_v10 = vld [vmem:[%s3682_s3] sm:$0xff] (!%p178_p9)  ;;  %v302_v14 = vand.u32 (!%p178_p9), 4294901760, %v283_v11  ;;  %v285_v15 = vld [vmem:[%s3682_s3 + $0x28] sm:$0xff] (!%p178_p9)  ;;  %v886_v16 = vand.u32 (!%p178_p9), 4294901760, %v282_v12  ;;  %2885 = vmatprep.subr.bf16.mxu1 (!%p178_p9), %v3161_v25 }
  0x10   : > { %v298_v13 = vand.u32 (!%p178_p9), 4294901760, %v280_v10  ;;  %v889_v19 = vand.u32 (!%p178_p9), 4294901760, %v285_v15  ;;  %vm3162_vm0 = vmmov (!%p178_p9), 0   ;;  %v3288_v27 = vsub.f32 (!%p178_p9), %v281_v6, %v296_v8  ;;  %s205_s10 = sand.u32 (!%p178_p9), 1, %s3147_s16   ;;  %s3043_s13 = smul.u32 (!%p178_p9), 1152, %s3212_s19 }
  0x11   : > { %v3267_v18 = vpack.c.bf16 (!%p178_p9), %v300_v9, %v296_v8  ;;  %v3276_v23 = vsub.f32 (!%p178_p9), %v283_v11, %v302_v14  ;;  %v3278_v24 = vsub.f32 (!%p178_p9), %v282_v12, %v886_v16  ;;  %2721 = vmatprep.mubr.msk.f32.mxu1 (!%p178_p9), %vm3162_vm0, %v3160_v5  ;;  %v3290_v28 = vsub.f32 (!%p178_p9), %v284_v7, %v300_v9  ;;  %s3035_s11 = smul.u32 (!%p178_p9), 72, %s205_s10  ;;  %s3638_s19 = scalar_lea.sflag (!%p178_p9), [#allocation3], %s205_s10 }
  0x12   : > { %v3269_v20 = vpack.c.bf16 (!%p178_p9), %v302_v14, %v298_v13  ;;  %v3271_v21 = vpack.c.bf16 (!%p178_p9), %v889_v19, %v886_v16  ;;  %v3274_v22 = vsub.f32 (!%p178_p9), %v280_v10, %v298_v13  ;;  %v3282_v26 = vsub.f32 (!%p178_p9), %v285_v15, %v889_v19  ;;  %s3634_s23 = scalar_lea.hbm (!%p178_p9), %s3683_s4, %s3043_s13  ;;  %s3163_s30 = smov (!%p178_p9), [#allocation2]  }
  0x13   : > { %2862 = vmatprep.subr.bf16.mxu0 (!%p178_p9), %v3267_v18  ;;  %v400_v29 = vand.u32 (!%p178_p9), 4294901760, %v3288_v27  ;;  %v412_v30 = vand.u32 (!%p178_p9), 4294901760, %v3290_v28  ;;  %v418_v32 = vand.u32 (!%p178_p9), 4294901760, %v3276_v23  ;;  %v985_v33 = vand.u32 (!%p178_p9), 4294901760, %v3278_v24  ;;  %s207_s12 = scalar_lea.vmem (!%p178_p9), [#allocation2], %s3035_s11 }
  0x14   : > { %2864 = vmatpush1.bf16.msra.mxu0 (!%p178_p9), %v3269_v20  ;;  %2887 = vmatpush3.bf16.msra.mxu1 (!%p178_p9), %v3271_v21  ;;  %v406_v31 = vand.u32 (!%p178_p9), 4294901760, %v3274_v22  ;;  %v992_v34 = vand.u32 (!%p178_p9), 4294901760, %v3282_v26  ;;  %v2869_v50 = vpack.c.bf16 (!%p178_p9), %v3290_v28, %v3288_v27  ;;  %v2871_v51 = vpack.c.bf16 (!%p178_p9), %v3276_v23, %v3274_v22  ;;  %s2559_s14 = sshll.u32 (!%p178_p9), %s207_s12, 4  ;;  %s3636_s14 = int_to_ptr.vmem [resolvable:$true] %s2559_s14 }
  0x15   : > { %s3691_s27 = smov (!%p209_p10, %s208_s27), 5  ;;  %2888 = vmatprep.subr.bf16.mxu1 %v3161_v25  ;;  %v401_v35 = vsub.f32 %v3288_v27, %v400_v29  ;;  %v413_v36 = vsub.f32 %v3290_v28, %v412_v30  ;;  %v419_v38 = vsub.f32 %v3276_v23, %v418_v32  ;;  %v986_v39 = vsub.f32 %v3278_v24, %v985_v33  ;;  %s3093_s29 = scalar_lea.vmem %s3636_s14, 1152 }
  0x16   : > { %s2637_s28 = sshll.u32 %s3691_s27, 3  ;;  %v407_v37 = vsub.f32 %v3274_v22, %v406_v31  ;;  %v993_v40 = vsub.f32 %v3282_v26, %v992_v34  ;;  %v2892_v52 = vpack.c.bf16 %v3282_v26, %v3278_v24  ;;  %v3310_v53 = vpack.c.bf16 %v412_v30, %v400_v29  ;;  %v272_v22 = vld [vmem:[%s3681_s2 + $0x8] sm:$0xff]  ;;  %p3094_p11 = scmp.ne.s32.totalorder %s3636_s14, %s3093_s29 }
  0x17   : > { %s218_s5 = scalar_lea.vmem %s3680_s1, %s2637_s28  ;;  %v402_v41 = vand.u32 4294901760, %v401_v35  ;;  %v414_v42 = vand.u32 4294901760, %v413_v36  ;;  %v420_v44 = vand.u32 4294901760, %v419_v38  ;;  %v987_v45 = vand.u32 4294901760, %v986_v39  ;;  %s212_s7 = scalar_lea.vmem %s3679_s0, %s2637_s28 }
  0x18   : > { %v224_v2 = vld [vmem:[%s218_s5] sm:$0xff]  ;;  %v225_v3 = vld [vmem:[%s218_s5 + $0x8] sm:$0xff]  ;;  %v226_v17 = vld [vmem:[%s218_s5 + $0x10] sm:$0xff]  ;;  %v408_v43 = vand.u32 4294901760, %v407_v37  ;;  %v994_v46 = vand.u32 4294901760, %v993_v40  ;;  %v3312_v54 = vpack.c.bf16 %v418_v32, %v406_v31  ;;  %v3314_v55 = vpack.c.bf16 %v992_v34, %v985_v33  ;;  %p3095_p12 = pnand %p3094_p11, %p3229_p5  ;;  %s3097_s5 = sshll.u32 %s3163_s30, 4  ;;  %s3098_s5 = int_to_ptr.vmem [resolvable:$false] %s3097_s5 }
  0x19   : > { %257 = vperm.xlu1 %3087, %v224_v2   ;;  %230 = vperm.xlu0 %3085, %v224_v2   ;;  %v2865_v47 = vpack.c.bf16 %v414_v42, %v402_v41  ;;  %v228_v59 = vand.u32 127, %v227_v56  ;;  %vm286_vm5 = vcmask 130048   ;;  %v221_v23 = vld [vmem:[%s212_s7] sm:$0xff]  ;;  %v222_v26 = vld [vmem:[%s212_s7 + $0x8] sm:$0xff]  ;;  %v223_v33 = vld [vmem:[%s212_s7 + $0x10] sm:$0xff]  ;;  %s3099_s6 = scalar_lea.vmem %s3098_s5, 2304  ;;  %p3100_p0 = scmp.lt.s32.totalorder %s3636_s14, %s3098_s5 }
  0x1a   : > { %v2867_v48 = vpack.c.bf16 %v420_v44, %v408_v43  ;;  %v2889_v49 = vpack.c.bf16 %v994_v46, %v987_v45  ;;  %p3096_p13 = pneg %p3095_p12  ;;  %p3101_p1 = scmp.lt.s32.totalorder %s3099_s6, %s3093_s29 }
  0x1b   : > { %2866 = vmatprep.subr.bf16.mxu0 %v2865_v47 }
  0x1c   : > { %p3102_p2 = por %p3101_p1, %p3100_p0 }
  0x1d   : > { %3088 = vset.pattern.permute.xlu1 %v3158_v1  ;;  %3086 = vset.pattern.permute.xlu0 %v3159_v4 }
  0x1e   : > { %233 = vperm.xlu1 %3088, %v225_v3   ;;  %242 = vperm.xlu0 %3086, %v224_v2   ;;  %p3103_p3 = pnand %p3102_p2, %p3096_p13 }
  0x22   : > { %3089 = vset.pattern.permute.xlu1 %v3159_v4  ;;  %3090 = vset.pattern.permute.xlu0 %v3157_v0 }
  0x23   : > { %245 = vperm.xlu1 %3089, %v225_v3   ;;  %260 = vperm.xlu0 %3090, %v225_v3  }
  0x27   : > { %3091 = vset.pattern.permute.xlu1 %v3158_v1  ;;  %263 = vperm.xlu0 %3090, %v226_v17  }
  0x28   : > { %236 = vperm.xlu1 %3091, %v226_v17  }
  0x2c   : > { %3092 = vset.pattern.permute.xlu1 %v3159_v4 }
  0x2d   : > { %248 = vperm.xlu1 %3092, %v226_v17  }
  0x98   : > { %v258_v57 = vpop.permute.xlu1 %257  ;;  %v231_v58 = vpop.permute.xlu0 %230 }
  0x99   : > { %vm238_vm1 = vcmp.eq.s32.totalorder %v231_v58, %v228_v59  ;;  %vm265_vm3 = vcmp.eq.s32.totalorder %v258_v57, %v228_v59 }
  0x9d   : > { %v234_v60 = vpop.permute.xlu1 %233  ;;  %v243_v61 = vpop.permute.xlu0 %242 }
  0x9e   : > { %vm250_vm2 = vcmp.eq.s32.totalorder %v243_v61, %v228_v59  ;;  %vm239_vm7 = vcmp.eq.s32.totalorder %v234_v60, %v228_v59 }
  0x9f   : > { %vm253_vm4 = vmor %vm238_vm1, %vm250_vm2  ;;  %vm1430_vm2 = vcmask 64512  }
  0xa0   : > { %vm268_vm6 = vmor %vm253_vm4, %vm265_vm3  ;;  %v1435_v32 = vsel %vm1430_vm2, %v222_v26, 0  ;;  %v1438_v39 = vsel %vm1430_vm2, %v223_v33, 0 }
  0xa1   : > { %v3317_v62 = vsel %vm268_vm6, 1.0, %v3160_v5  ;;  %v3458_v38 = vand.u32 4294901760, %v1435_v32  ;;  %v3477_v44 = vand.u32 4294901760, %v1438_v39 }
  0xa2   : > { %v246_v63 = vpop.permute.xlu1 %245  ;;  %v261_v0 = vpop.permute.xlu0 %260  ;;  %v288_v1 = vsel %vm286_vm5, %v3317_v62, 0 }
  0xa3   : > { %vm251_vm8 = vcmp.eq.s32.totalorder %v246_v63, %v228_v59  ;;  %vm266_vm9 = vcmp.eq.s32.totalorder %v261_v0, %v228_v59  ;;  %v366_v2 = vsub.f32 %v288_v1, %v288_v1  ;;  %v3475_v43 = vsub.f32 %v1435_v32, %v3458_v38 }
  0xa4   : > { %vm254_vm10 = vmor %vm239_vm7, %vm251_vm8 }
  0xa5   : > { %vm269_vm11 = vmor %vm254_vm10, %vm266_vm9  ;;  %v3321_v3 = vand.u32 4294901760, %v366_v2 }
  0xa6   : > { %v3324_v4 = vsel %vm269_vm11, 1.0, %v3160_v5  ;;  %v264_v12 = vpop.permute.xlu0 %263 }
  0xa7   : > { %v237_v6 = vpop.permute.xlu1 %236  ;;  %v368_v7 = vsub.f32 %v366_v2, %v3321_v3  ;;  %v291_v8 = vsel %vm286_vm5, %v3324_v4, 0  ;;  %vm267_vm14 = vcmp.eq.s32.totalorder %v264_v12, %v228_v59 }
  0xa8   : > { %v377_v9 = vsub.f32 %v291_v8, %v291_v8  ;;  %vm240_vm12 = vcmp.eq.s32.totalorder %v237_v6, %v228_v59 }
  0xa9   : > { %v369_v10 = vand.u32 4294901760, %v368_v7 }
  0xaa   : > { %v3329_v11 = vand.u32 4294901760, %v377_v9 }
  0xab   : > { %370 = vmatmul.mubr.f32.vlgmr.msra.gmra.mrb[0].mxu0 %v369_v10  ;;  %2722 = vmatmul.mubr.f32.vlgmr.msra.gmra.mrb[0].mxu1 %v369_v10 }
  0xac   : > { %v249_v13 = vpop.permute.xlu1 %248  ;;  %375 = vmatprep.mubr.f32.mxu0 %v3160_v5  ;;  %2724 = vmatprep.mubr.msk.f32.mxu1 %vm3162_vm0, %v3160_v5  ;;  %v379_v14 = vsub.f32 %v377_v9, %v3329_v11 }
  0xad   : > { %vm252_vm13 = vcmp.eq.s32.totalorder %v249_v13, %v228_v59  ;;  %2868 = vmatpush1.bf16.msra.mxu0 %v2867_v48  ;;  %2890 = vmatpush3.bf16.msra.mxu1 %v2889_v49  ;;  %v3495_v48 = vsub.f32 %v1438_v39, %v3477_v44 }
  0xae   : > { %vm255_vm15 = vmor %vm240_vm12, %vm252_vm13  ;;  %v380_v15 = vand.u32 4294901760, %v379_v14  ;;  %2870 = vmatprep.subr.bf16.mxu0 %v2869_v50  ;;  %2891 = vmatprep.subr.bf16.mxu1 %v3161_v25  ;;  %v3504_v50 = vand.u32 4294901760, %v3475_v43 }
  0xaf   : > { %vm270_vm1 = vmor %vm255_vm15, %vm267_vm14 }
  0xb0   : > { %v3337_v16 = vsel %vm270_vm1, 1.0, %v3160_v5  ;;  %381 = vmatmul.mubr.f32.gmra.mrb[2].mxu0 %v380_v15  ;;  %2725 = vmatmul.mubr.f32.gmra.mrb[2].mxu1 %v380_v15 }
  0xb1   : > { %386 = vmatprep.mubr.f32.mxu0 %v3160_v5  ;;  %2727 = vmatprep.mubr.msk.f32.mxu1 %vm3162_vm0, %v3160_v5  ;;  %v294_v17 = vsel %vm286_vm5, %v3337_v16, 0 }
  0xb2   : > { %v388_v19 = vsub.f32 %v294_v17, %v294_v17 }
  0xb4   : > { %v389_v27 = vand.u32 4294901760, %v388_v19 }
  0xb6   : > { %v390_v28 = vsub.f32 %v388_v19, %v389_v27 }
  0xb8   : > { %v391_v29 = vand.u32 4294901760, %v390_v28 }
  0xba   : > { %392 = vmatmul.mubr.f32.gmra.mrb[4].mxu0 %v391_v29  ;;  %2728 = vmatmul.mubr.f32.gmra.mrb[4].mxu1 %v391_v29 }
  0xbb   : > { %482 = vmatprep.mubr.f32.mxu0 %v3160_v5  ;;  %2734 = vmatprep.mubr.msk.f32.mxu1 %vm3162_vm0, %v3160_v5 }
  0xbe   : > { %2642 = vmatmul.mubr.msk.f32.vlgmr.msra.gmra.mrb[0].mxu0 %vm286_vm5, %v3317_v62  ;;  %2735 = vmatmul.mubr.msk.f32.vlgmr.msra.gmra.mrb[0].mxu1 %vm286_vm5, %v3317_v62 }
  0xbf   : > { %2872 = vmatpush1.bf16.msra.mxu0 %v2871_v51  ;;  %2893 = vmatpush3.bf16.msra.mxu1 %v2892_v52 }
  0xc0   : > { %489 = vmatprep.mubr.f32.mxu0 %v3160_v5  ;;  %2737 = vmatprep.mubr.msk.f32.mxu1 %vm3162_vm0, %v3160_v5 }
  0xc1   : > { %2874 = vmatprep.subr.bf16.mxu0 %v3267_v18  ;;  %2894 = vmatprep.subr.bf16.mxu1 %v3161_v25 }
  0xc2   : > { %2643 = vmatmul.mubr.msk.f32.gmra.mrb[2].mxu0 %vm286_vm5, %v3324_v4  ;;  %2738 = vmatmul.mubr.msk.f32.gmra.mrb[2].mxu1 %vm286_vm5, %v3324_v4 }
  0xc3   : > { %496 = vmatprep.mubr.f32.mxu0 %v3160_v5  ;;  %2740 = vmatprep.mubr.msk.f32.mxu1 %vm3162_vm0, %v3160_v5 }
  0xc6   : > { %2644 = vmatmul.mubr.msk.f32.gmra.mrb[4].mxu0 %vm286_vm5, %v3337_v16  ;;  %2741 = vmatmul.mubr.msk.f32.gmra.mrb[4].mxu1 %vm286_vm5, %v3337_v16 }
  0xc7   : > { %576 = vmatprep.mubr.f32.mxu0 %v3160_v5  ;;  %2747 = vmatprep.mubr.msk.f32.mxu1 %vm3162_vm0, %v3160_v5 }
  0xca   : > { %579 = vmatmul.mubr.f32.vlgmr.msra.gmra.mrb[0].mxu0 %v366_v2  ;;  %2748 = vmatmul.mubr.f32.vlgmr.msra.gmra.mrb[0].mxu1 %v366_v2 }
  0xcb   : > { %2876 = vmatpush1.bf16.msra.mxu0 %v3269_v20  ;;  %2896 = vmatpush3.bf16.msra.mxu1 %v3271_v21 }
  0xcc   : > { %584 = vmatprep.mubr.f32.mxu0 %v3160_v5  ;;  %2750 = vmatprep.mubr.msk.f32.mxu1 %vm3162_vm0, %v3160_v5 }
  0xcd   : > { %2878 = vmatprep.subr.bf16.mxu0 %v3310_v53  ;;  %2897 = vmatprep.subr.bf16.mxu1 %v3161_v25 }
  0xce   : > { %587 = vmatmul.mubr.f32.gmra.mrb[2].mxu0 %v377_v9  ;;  %2751 = vmatmul.mubr.f32.gmra.mrb[2].mxu1 %v377_v9 }
  0xcf   : > { %592 = vmatprep.mubr.f32.mxu0 %v3160_v5  ;;  %2753 = vmatprep.mubr.msk.f32.mxu1 %vm3162_vm0, %v3160_v5 }
  0xd2   : > { %595 = vmatmul.mubr.f32.gmra.mrb[4].mxu0 %v388_v19  ;;  %2754 = vmatmul.mubr.f32.gmra.mrb[4].mxu1 %v388_v19 }
  0xd3   : > { %669 = vmatprep.mubr.f32.mxu0 %v3160_v5  ;;  %2760 = vmatprep.mubr.msk.f32.mxu1 %vm3162_vm0, %v3160_v5 }
  0xd6   : > { %673 = vmatmul.mubr.f32.vlgmr.msra.gmra.mrb[0].mxu0 %v3321_v3  ;;  %2761 = vmatmul.mubr.f32.vlgmr.msra.gmra.mrb[0].mxu1 %v3321_v3 }
  0xd7   : > { %2880 = vmatpush1.bf16.msra.mxu0 %v3312_v54  ;;  %2899 = vmatpush3.bf16.msra.mxu1 %v3314_v55  ;;  %v1521_v54 = vsub.f32 %v3475_v43, %v3504_v50  ;;  %v3522_v55 = vand.u32 4294901760, %v3495_v48 }
  0xd8   : > { %678 = vmatprep.mubr.f32.mxu0 %v3160_v5  ;;  %2763 = vmatprep.mubr.msk.f32.mxu1 %vm3162_vm0, %v3160_v5 }
  0xd9   : > { %2882 = vmatprep.subr.bf16.mxu0 %v3267_v18  ;;  %2900 = vmatprep.subr.bf16.mxu1 %v3161_v25  ;;  %v3414_v18 = vand.u32 4294901760, %v272_v22  ;;  %v1432_v25 = vsel %vm1430_vm2, %v221_v23, 0  ;;  %v1522_v58 = vand.u32 4294901760, %v1521_v54  ;;  %v1532_v59 = vsub.f32 %v3495_v48, %v3522_v55 }
  0xda   : > { %682 = vmatmul.mubr.f32.gmra.mrb[2].mxu0 %v3329_v11  ;;  %2764 = vmatmul.mubr.f32.gmra.mrb[2].mxu1 %v3329_v11  ;;  %v3432_v31 = vand.u32 4294901760, %v1432_v25 }
  0xdb   : > { %687 = vmatprep.mubr.f32.mxu0 %v3160_v5  ;;  %2766 = vmatprep.mubr.msk.f32.mxu1 %vm3162_vm0, %v3160_v5  ;;  %v3417_v24 = vsub.f32 %v272_v22, %v3414_v18  ;;  %v1533_v60 = vand.u32 4294901760, %v1532_v59 }
  0xdc   : > { %v3456_v37 = vsub.f32 %v1432_v25, %v3432_v31 }
  0xdd   : > { %v1542_v30 = vand.u32 4294901760, %v3417_v24 }
  0xde   : > { %691 = vmatmul.mubr.f32.gmra.mrb[4].mxu0 %v389_v27  ;;  %2767 = vmatmul.mubr.f32.gmra.mrb[4].mxu1 %v389_v27  ;;  %v3484_v45 = vand.u32 4294901760, %v3456_v37 }
  0xdf   : > { %773 = vmatprep.mubr.f32.mxu0 %v3160_v5  ;;  %2773 = vmatprep.mubr.msk.f32.mxu1 %vm3162_vm0, %v3160_v5  ;;  %v1543_v36 = vsub.f32 %v3417_v24, %v1542_v30 }
  0xe0   : > { %v1510_v49 = vsub.f32 %v3456_v37, %v3484_v45 }
  0xe1   : > { %v1544_v42 = vand.u32 4294901760, %v1543_v36 }
  0xe2   : > { %2645 = vmatmul.mubr.msk.f32.vlgmr.msra.gmra.mrb[0].mxu0 %vm286_vm5, %v3317_v62  ;;  %2774 = vmatmul.mubr.msk.f32.vlgmr.msra.gmra.mrb[0].mxu1 %vm286_vm5, %v3317_v62  ;;  %v1511_v53 = vand.u32 4294901760, %v1510_v49 }
  0xe3   : > { %2884 = vmatpush1.bf16.msra.mxu0 %v3269_v20  ;;  %2902 = vmatpush3.bf16.msra.mxu1 %v3271_v21  ;;  %v271_v20 = vld [vmem:[%s3681_s2] sm:$0xff]  ;;  %v273_v21 = vld [vmem:[%s3681_s2 + $0x10] sm:$0xff] }
  0xe4   : > { %780 = vmatprep.mubr.f32.mxu0 %v3160_v5  ;;  %2776 = vmatprep.mubr.msk.f32.mxu1 %vm3162_vm0, %v3160_v5  ;;  %v3448_v34 = vand.u32 4294901760, %v271_v20  ;;  %v3450_v35 = vand.u32 4294901760, %v273_v21 }
  0xe5   : > { %1441 = vmatprep.subr.mxu0 %v3414_v18  ;;  %2795 = vmatprep.subr.mxu1 %v3160_v5 }
  0xe6   : > { %2646 = vmatmul.mubr.msk.f32.gmra.mrb[2].mxu0 %vm286_vm5, %v3324_v4  ;;  %2777 = vmatmul.mubr.msk.f32.gmra.mrb[2].mxu1 %vm286_vm5, %v3324_v4  ;;  %v3469_v40 = vsub.f32 %v271_v20, %v3448_v34  ;;  %v3472_v41 = vsub.f32 %v273_v21, %v3450_v35 }
  0xe7   : > { %787 = vmatprep.mubr.f32.mxu0 %v3160_v5  ;;  %2779 = vmatprep.mubr.msk.f32.mxu1 %vm3162_vm0, %v3160_v5 }
  0xe8   : > { %v1548_v46 = vand.u32 4294901760, %v3469_v40  ;;  %v2102_v47 = vand.u32 4294901760, %v3472_v41 }
  0xea   : > { %2647 = vmatmul.mubr.msk.f32.gmra.mrb[4].mxu0 %vm286_vm5, %v3337_v16  ;;  %2780 = vmatmul.mubr.msk.f32.gmra.mrb[4].mxu1 %vm286_vm5, %v3337_v16  ;;  %v1549_v51 = vsub.f32 %v3469_v40, %v1548_v46  ;;  %v2103_v52 = vsub.f32 %v3472_v41, %v2102_v47 }
  0xeb   : > { %863 = vmatprep.mubr.f32.mxu0 %v3160_v5  ;;  %2786 = vmatprep.mubr.msk.f32.mxu1 %vm3162_vm0, %v3160_v5 }
  0xec   : > { %v1550_v56 = vand.u32 4294901760, %v1549_v51  ;;  %v2104_v57 = vand.u32 4294901760, %v2103_v52 }
  0xee   : > { %2648 = vmatmul.mubr.msk.f32.vlgmr.msra.gmra.mrb[0].mxu0 %vm286_vm5, %v3317_v62  ;;  %2787 = vmatmul.mubr.msk.f32.vlgmr.msra.gmra.mrb[0].mxu1 %vm286_vm5, %v3317_v62 }
  0xef   : > { %1443 = vmatpush1.msra.mxu0 %v3448_v34  ;;  %2796 = vmatpush3.msra.mxu1 %v3450_v35 }
  0xf0   : > { %870 = vmatprep.mubr.f32.mxu0 %v3160_v5  ;;  %2789 = vmatprep.mubr.msk.f32.mxu1 %vm3162_vm0, %v3160_v5 }
  0xf1   : > { %1545 = vmatprep.subr.mxu0 %v1544_v42  ;;  %2806 = vmatprep.subr.mxu1 %v3160_v5 }
  0xf2   : > { %2649 = vmatmul.mubr.msk.f32.gmra.mrb[2].mxu0 %vm286_vm5, %v3324_v4  ;;  %2790 = vmatmul.mubr.msk.f32.gmra.mrb[2].mxu1 %vm286_vm5, %v3324_v4 }
  0xf3   : > { %877 = vmatprep.mubr.f32.mxu0 %v3160_v5  ;;  %2792 = vmatprep.mubr.msk.f32.mxu1 %vm3162_vm0, %v3160_v5 }
  0xf6   : > { %2650 = vmatmul.mubr.msk.f32.gmra.mrb[4].mxu0 %vm286_vm5, %v3337_v16  ;;  %2793 = vmatmul.mubr.msk.f32.gmra.mrb[4].mxu1 %vm286_vm5, %v3337_v16 }
  0xf7   : > { %1506 = vmatprep.mubr.f32.mxu0 %v3160_v5  ;;  %2797 = vmatprep.mubr.msk.f32.mxu1 %vm3162_vm0, %v3160_v5 }
  0xfa   : > { %1512 = vmatmul.mubr.f32.vlgmr.msra.gmra.mrb[0].mxu0 %v1511_v53  ;;  %2798 = vmatmul.mubr.f32.vlgmr.msra.gmra.mrb[0].mxu1 %v1511_v53 }
  0xfb   : > { %1551 = vmatpush1.msra.mxu0 %v1550_v56  ;;  %2807 = vmatpush3.msra.mxu1 %v2104_v57 }
  0xfc   : > { %1517 = vmatprep.mubr.f32.mxu0 %v3160_v5  ;;  %2800 = vmatprep.mubr.msk.f32.mxu1 %vm3162_vm0, %v3160_v5 }
  0xfd   : > { %1638 = vmatprep.subr.mxu0 %v3417_v24  ;;  %2817 = vmatprep.subr.mxu1 %v3160_v5 }
  0xfe   : > { %1523 = vmatmul.mubr.f32.gmra.mrb[2].mxu0 %v1522_v58  ;;  %2801 = vmatmul.mubr.f32.gmra.mrb[2].mxu1 %v1522_v58 }
  0xff   : > { %1528 = vmatprep.mubr.f32.mxu0 %v3160_v5  ;;  %2803 = vmatprep.mubr.msk.f32.mxu1 %vm3162_vm0, %v3160_v5 }
 0x102   : > { %1534 = vmatmul.mubr.f32.gmra.mrb[4].mxu0 %v1533_v60  ;;  %2804 = vmatmul.mubr.f32.gmra.mrb[4].mxu1 %v1533_v60 }
 0x103   : > { %1614 = vmatprep.mubr.f32.mxu0 %v3160_v5  ;;  %2808 = vmatprep.mubr.msk.f32.mxu1 %vm3162_vm0, %v3160_v5 }
 0x106   : > { %1616 = vmatmul.mubr.f32.vlgmr.msra.gmra.mrb[0].mxu0 %v3432_v31  ;;  %2809 = vmatmul.mubr.f32.vlgmr.msra.gmra.mrb[0].mxu1 %v3432_v31 }
 0x107   : > { %1641 = vmatpush1.msra.mxu0 %v3469_v40  ;;  %2818 = vmatpush3.msra.mxu1 %v3472_v41 }
 0x108   : > { %1621 = vmatprep.mubr.f32.mxu0 %v3160_v5  ;;  %2811 = vmatprep.mubr.msk.f32.mxu1 %vm3162_vm0, %v3160_v5 }
 0x109   : > { %1730 = vmatprep.subr.mxu0 %v3414_v18  ;;  %2828 = vmatprep.subr.mxu1 %v3160_v5 }
 0x10a   : > { %1623 = vmatmul.mubr.f32.gmra.mrb[2].mxu0 %v3458_v38  ;;  %2812 = vmatmul.mubr.f32.gmra.mrb[2].mxu1 %v3458_v38 }
 0x10b   : > { %1628 = vmatprep.mubr.f32.mxu0 %v3160_v5  ;;  %2814 = vmatprep.mubr.msk.f32.mxu1 %vm3162_vm0, %v3160_v5 }
 0x10e   : > { %1630 = vmatmul.mubr.f32.gmra.mrb[4].mxu0 %v3477_v44  ;;  %2815 = vmatmul.mubr.f32.gmra.mrb[4].mxu1 %v3477_v44 }
 0x10f   : > { %1704 = vmatprep.mubr.f32.mxu0 %v3160_v5  ;;  %2819 = vmatprep.mubr.msk.f32.mxu1 %vm3162_vm0, %v3160_v5 }
 0x112   : > { %1707 = vmatmul.mubr.f32.vlgmr.msra.gmra.mrb[0].mxu0 %v3456_v37  ;;  %2820 = vmatmul.mubr.f32.vlgmr.msra.gmra.mrb[0].mxu1 %v3456_v37 }
 0x113   : > { %1732 = vmatpush1.msra.mxu0 %v3448_v34  ;;  %2829 = vmatpush3.msra.mxu1 %v3450_v35 }
 0x114   : > { %1712 = vmatprep.mubr.f32.mxu0 %v3160_v5  ;;  %2822 = vmatprep.mubr.msk.f32.mxu1 %vm3162_vm0, %v3160_v5 }
 0x115   : > { %1826 = vmatprep.subr.mxu0 %v1542_v30  ;;  %2839 = vmatprep.subr.mxu1 %v3160_v5 }
 0x116   : > { %1715 = vmatmul.mubr.f32.gmra.mrb[2].mxu0 %v3475_v43  ;;  %2823 = vmatmul.mubr.f32.gmra.mrb[2].mxu1 %v3475_v43 }
 0x117   : > { %1720 = vmatprep.mubr.f32.mxu0 %v3160_v5  ;;  %2825 = vmatprep.mubr.msk.f32.mxu1 %vm3162_vm0, %v3160_v5 }
 0x11a   : > { %1723 = vmatmul.mubr.f32.gmra.mrb[4].mxu0 %v3495_v48  ;;  %2826 = vmatmul.mubr.f32.gmra.mrb[4].mxu1 %v3495_v48 }
 0x11b   : > { %1795 = vmatprep.mubr.f32.mxu0 %v3160_v5  ;;  %2830 = vmatprep.mubr.msk.f32.mxu1 %vm3162_vm0, %v3160_v5 }
 0x11e   : > { %1799 = vmatmul.mubr.f32.vlgmr.msra.gmra.mrb[0].mxu0 %v3484_v45  ;;  %2831 = vmatmul.mubr.f32.vlgmr.msra.gmra.mrb[0].mxu1 %v3484_v45 }
 0x11f   : > { %1830 = vmatpush1.msra.mxu0 %v1548_v46  ;;  %2840 = vmatpush3.msra.mxu1 %v2102_v47 }
 0x120   : > { %1804 = vmatprep.mubr.f32.mxu0 %v3160_v5  ;;  %2833 = vmatprep.mubr.msk.f32.mxu1 %vm3162_vm0, %v3160_v5 }
 0x121   : > { %1916 = vmatprep.subr.mxu0 %v3414_v18  ;;  %2850 = vmatprep.subr.mxu1 %v3160_v5 }
 0x122   : > { %1808 = vmatmul.mubr.f32.gmra.mrb[2].mxu0 %v3504_v50  ;;  %2834 = vmatmul.mubr.f32.gmra.mrb[2].mxu1 %v3504_v50 }
 0x123   : > { %1813 = vmatprep.mubr.f32.mxu0 %v3160_v5  ;;  %2836 = vmatprep.mubr.msk.f32.mxu1 %vm3162_vm0, %v3160_v5 }
 0x126   : > { %1817 = vmatmul.mubr.f32.gmra.mrb[4].mxu0 %v3522_v55  ;;  %2837 = vmatmul.mubr.f32.gmra.mrb[4].mxu1 %v3522_v55 }
 0x127   : > { %1893 = vmatprep.mubr.f32.mxu0 %v3160_v5  ;;  %2841 = vmatprep.mubr.msk.f32.mxu1 %vm3162_vm0, %v3160_v5 }
 0x12a   : > { %1895 = vmatmul.mubr.f32.vlgmr.msra.gmra.mrb[0].mxu0 %v3432_v31  ;;  %2842 = vmatmul.mubr.f32.vlgmr.msra.gmra.mrb[0].mxu1 %v3432_v31 }
 0x12b   : > { %1918 = vmatpush1.msra.mxu0 %v3448_v34  ;;  %2851 = vmatpush3.msra.mxu1 %v3450_v35 }
 0x12c   : > { %1900 = vmatprep.mubr.f32.mxu0 %v3160_v5  ;;  %2844 = vmatprep.mubr.msk.f32.mxu1 %vm3162_vm0, %v3160_v5 }
 0x12e   : > { %1902 = vmatmul.mubr.f32.gmra.mrb[2].mxu0 %v3458_v38  ;;  %2845 = vmatmul.mubr.f32.gmra.mrb[2].mxu1 %v3458_v38 }
 0x12f   : > { %1907 = vmatprep.mubr.f32.mxu0 %v3160_v5  ;;  %2847 = vmatprep.mubr.msk.f32.mxu1 %vm3162_vm0, %v3160_v5 }
 0x132   : > { %1909 = vmatmul.mubr.f32.gmra.mrb[4].mxu0 %v3477_v44  ;;  %2848 = vmatmul.mubr.f32.gmra.mrb[4].mxu1 %v3477_v44 }
 0x133   : > { %1981 = vmatprep.mubr.f32.mxu0 %v3160_v5  ;;  %2852 = vmatprep.mubr.msk.f32.mxu1 %vm3162_vm0, %v3160_v5 }
 0x136   : > { %1983 = vmatmul.mubr.f32.vlgmr.msra.gmra.mrb[0].mxu0 %v3432_v31  ;;  %2853 = vmatmul.mubr.f32.vlgmr.msra.gmra.mrb[0].mxu1 %v3432_v31 }
 0x137   : > { %1988 = vmatprep.mubr.f32.mxu0 %v3160_v5  ;;  %2855 = vmatprep.mubr.msk.f32.mxu1 %vm3162_vm0, %v3160_v5 }
 0x13a   : > { %1990 = vmatmul.mubr.f32.gmra.mrb[2].mxu0 %v3458_v38  ;;  %2856 = vmatmul.mubr.f32.gmra.mrb[2].mxu1 %v3458_v38 }
 0x13b   : > { %1995 = vmatprep.mubr.f32.mxu0 %v3160_v5  ;;  %2858 = vmatprep.mubr.msk.f32.mxu1 %vm3162_vm0, %v3160_v5 }
 0x13e   : > { %1997 = vmatmul.mubr.f32.gmra.mrb[4].mxu0 %v3477_v44  ;;  %2859 = vmatmul.mubr.f32.gmra.mrb[4].mxu1 %v3477_v44 }
 0x209   : > { %v1984_v61 = vpop.f32.mrb[0].mxu0  ;;  %v2519_v62 = vpop.f32.mrb[0].mxu1 }
 0x20a   : > { %2535 = vst [vmem:[%s207_s12] sm:$0xff] %v1984_v61  ;;  %2537 = vst [vmem:[%s207_s12 + $0x10] sm:$0xff] %v2519_v62  ;;  %v1986_v63 = vpop.f32.mrb[1].mxu0  ;;  %v2854_v0 = vpop.f32.mrb[1].mxu1 }
 0x20b   : > { %2536 = vst [vmem:[%s207_s12 + $0x8] sm:$0xff] %v1986_v63 }
 0x20d   : > { %v1991_v1 = vpop.f32.mrb[2].mxu0  ;;  %v2525_v2 = vpop.f32.mrb[2].mxu1 }
 0x20e   : > { %2538 = vst [vmem:[%s207_s12 + $0x18] sm:$0xff] %v1991_v1  ;;  %2540 = vst [vmem:[%s207_s12 + $0x28] sm:$0xff] %v2525_v2  ;;  %v1993_v5 = vpop.f32.mrb[3].mxu0  ;;  %v2857_v3 = vpop.f32.mrb[3].mxu1 }
 0x20f   : > { %2539 = vst [vmem:[%s207_s12 + $0x20] sm:$0xff] %v1993_v5 }
 0x211   : > { %v1998_v4 = vpop.f32.mrb[4].mxu0  ;;  %v2531_v6 = vpop.f32.mrb[4].mxu1 }
 0x212   : > { %2541 = vst [vmem:[%s207_s12 + $0x30] sm:$0xff] %v1998_v4  ;;  %2543 = vst [vmem:[%s207_s12 + $0x40] sm:$0xff] %v2531_v6  ;;  %v2000_v7 = vpop.f32.mrb[5].mxu0  ;;  %v2860_v8 = vpop.f32.mrb[5].mxu1 }
 0x213   : > { %2542 = vst [vmem:[%s207_s12 + $0x38] sm:$0xff] %v2000_v7 }
 0x214   : > { %3106 = shalt.err (!%p3103_p3)
}
 0x215   : > { %s3107_s7 = scalar_lea.hbm %s3634_s23, 1152  ;;  %s3111_s8 = scalar_lea.hbm %s3683_s4, 2304 }
 0x216   : > { %p3108_p4 = scmp.ne.s32.totalorder %s3634_s23, %s3107_s7  ;;  %p3112_p9 = scmp.lt.u32.totalorder %s3634_s23, %s3683_s4 }
 0x217   : > { %p3113_p10 = scmp.lt.u32.totalorder %s3111_s8, %s3107_s7  ;;  %p3115_p12 = scmp.lt.u32.totalorder %s3107_s7, %s3634_s23 }
 0x218   : > { %p3109_p7 = pnand %p3108_p4, %p3229_p5 }
 0x219   : > { %p3114_p11 = por %p3113_p10, %p3112_p9 }
 0x21a   : > { %p3110_p8 = pneg %p3109_p7 }
 0x21b   : > { %p3116_p13 = por %p3115_p12, %p3114_p11 }
 0x21d   : > { %p3117_p0 = pnand %p3116_p13, %p3110_p8 }
 0x21f   : > { %3120 = shalt.err (!%p3117_p0)
}
 0x220   : > { %s3164_s11 = smov 384   ;;  %s3165_s12 = smov 24  }
 0x221   : > { %3037 = dma.vmem_to_hbm [thread:$0]  (%p3229_p5), %s3636_s14, 1152, %s3634_s23, %s3638_s19, %s3164_s11, %s3164_s11, %s3165_s12  }
 0x222 PF: > { %p3044_p1 = scmp.ge.s32.totalorder %s3155_s18, 2  ;;  %s2574_s13 = sand.u32 1, %s3143_s15  }
 0x223   : > { %s2575_s20 = scalar_lea.sflag [#allocation3], %s2574_s13 }
 0x224   : > { %p3040_p2 = pnand %p3044_p1, %p3233_p6 }
 0x226   : > { %3138 = dma.done.wait (!%p3040_p2), %s2575_s20, 1152  }
 0x227   : > { %3140 = vsyncadd (!%p3040_p2), %s2575_s20, 4294966144  ;;  %p14_p3 = scmp.ge.s32.totalorder %s3216_s21, 4   ;;  %s3686_s15 = smov %s3147_s16 }
 0x228   : > { %s3687_s16 = smov %s3151_s17  ;;  %s3688_s17 = smov %s3227_s24 }
 0x229   : > { %s3689_s18 = smov %s3216_s21  ;;  %16 = sbr.rel (!%p14_p3) target bundleno = 3 (0x3), region = 74 }
 0x230   :  { %2580 = vsyncpa [#allocation3], 1 }
 0x231   :  { %2582 = vsyncpa [#allocation3 + $0x1], 1 }

</bundles_post_ra>
